<compile_context>
chip_gen: v7x
topology: tpu7x:2x2x1
jax: 0.10.0
libtpu: 0.0.40
codegen_flags: <defaults>
</compile_context>

<pallas_src>
import functools

import jax
import jax.numpy as jnp
from jax.experimental import pallas as pl
from jax.experimental.pallas import tpu as pltpu

# ---- scaled-down ViT-B/16 config (same structure as timm ViT, small dims) ----
IMG = 32            # image size (timm: 224)
PATCH = 16          # patch size (ViT-B/16)
CIN = 3             # input channels
NPATCH = (IMG // PATCH) ** 2     # 4 patches
NTOK = NPATCH + 1                # +1 cls token -> 5 real tokens
NTOK_PAD = 8                     # padded to sublane multiple
DIM = 64            # embed dim (timm: 768)
HEADS = 4           # attention heads (timm: 12)
HEAD_DIM = DIM // HEADS          # 16
MLP = 4 * DIM       # mlp hidden (ratio 4)
DEPTH = 2           # transformer blocks (timm: 12)
NCLS = 10           # replaced head: nn.Linear(in_features, n_classes)
NCLS_PAD = 128      # lane-dense padded logits (sliced back to NCLS in wrapper)
CPP = CIN * PATCH * PATCH        # 768 = flattened patch
EPS = 1e-6          # timm ViT LayerNorm eps
CDT = jnp.bfloat16  # MXU operand dtype (f32 accumulation)
CHUNK_B = 1         # batch elements per grid chunk (batch axis is "parallel")
NEG_BIG = -1e30     # additive mask for padded keys


# ----------------------------- in-kernel helpers ------------------------------

def _layer_norm(x, w, b):
    mu = jnp.mean(x, axis=-1, keepdims=True)
    var = jnp.mean((x - mu) ** 2, axis=-1, keepdims=True)
    return (x - mu) * jax.lax.rsqrt(var + EPS) * w + b


def _gelu(x):
    # exact (erf) GELU, matching nn.GELU() used by timm ViT
    return 0.5 * x * (1.0 + jax.lax.erf(x * 0.7071067811865476))


# ------------------------------ fused forward kernel ---------------------------

def vit_kernel(cb,
               xp_ref, pw_ref, tb_ref,
               ln1w_ref, ln1b_ref, qkvw_ref, qkvb_ref, projw_ref, projb_ref,
               ln2w_ref, ln2b_ref, fc1w_ref, fc1b_ref, fc2w_ref, fc2b_ref,
               nw_ref, nb_ref, hw_ref, hb_ref,
               o_ref,
               x_ref):
    d = pl.program_id(1)
    rows = cb * NTOK_PAD

    # ---- layer 0: patch embed (conv16x16/s16 as one matmul) + token assembly --
    # xp is pre-padded host-side: row 0 (cls slot) and rows 5..7 are zero, so the
    # matmul yields zeros there; tb carries cls_token + pos_embed + patch bias
    # per token row (zeros on pad rows).  All stores are 8-sublane aligned.
    @pl.when(d == 0)
    def _():
        tok = jnp.dot(xp_ref[...], pw_ref[...],
                      preferred_element_type=jnp.float32)            # [cb*8, DIM]
        tok = (tok.reshape(cb, NTOK_PAD, DIM)
               + tb_ref[...][None, :, :]).reshape(rows, DIM)
        x_ref[...] = tok

    x = x_ref[...]                                                   # [cb*8, DIM] f32

    # additive key mask: real keys 0..NTOK-1 get 0, padded keys get -1e30
    kbias = jnp.where(
        jax.lax.broadcasted_iota(jnp.int32, (1, 1, NTOK_PAD), 2) < NTOK,
        0.0, NEG_BIG).astype(jnp.float32)

    # ---- multi-head self-attention (pre-LN); attn scale folded into qkv_w/q ---
    h1 = _layer_norm(x, ln1w_ref[...], ln1b_ref[...])
    qkv = (jnp.dot(h1.astype(CDT), qkvw_ref[...],
                   preferred_element_type=jnp.float32)
           + qkvb_ref[...])                                          # [cb*8, 3*DIM]

    def split_heads(t):
        # [cb*8, DIM] -> [HEADS*cb, 8, HEAD_DIM]  (head-major batch; O(HEADS) slices)
        t3 = t.reshape(cb, NTOK_PAD, DIM)
        return jnp.concatenate(
            [t3[:, :, h * HEAD_DIM:(h + 1) * HEAD_DIM] for h in range(HEADS)],
            axis=0)

    qh = split_heads(qkv[:, 0 * DIM:1 * DIM]).astype(CDT)
    kh = split_heads(qkv[:, 1 * DIM:2 * DIM]).astype(CDT)
    vh = split_heads(qkv[:, 2 * DIM:3 * DIM]).astype(CDT)

    # head-batched attention: contract on the last dim (no explicit .T)
    s = (jnp.einsum('bqd,bkd->bqk', qh, kh,
                    preferred_element_type=jnp.float32)
         + kbias)                                                    # [H*cb, 8, 8]
    s = s - jnp.max(s, axis=-1, keepdims=True)
    p = jnp.exp(s)
    p = p * pl.reciprocal(jnp.sum(p, axis=-1, keepdims=True), approx=True)
    o = jnp.einsum('bqk,bkd->bqd', p.astype(CDT), vh,
                   preferred_element_type=jnp.float32)               # [H*cb, 8, Hd]

    # merge heads: HEADS leading-dim slices + one lane concatenate
    attn = jnp.concatenate(
        [o[h * cb:(h + 1) * cb] for h in range(HEADS)], axis=-1)     # [cb, 8, DIM]
    attn = attn.reshape(rows, DIM)
    attn = (jnp.dot(attn.astype(CDT), projw_ref[...],
                    preferred_element_type=jnp.float32)
            + projb_ref[...])
    x = x + attn                                                     # residual 1

    # ---- MLP (pre-LN) ----
    h2 = _layer_norm(x, ln2w_ref[...], ln2b_ref[...])
    h2 = (jnp.dot(h2.astype(CDT), fc1w_ref[...],
                  preferred_element_type=jnp.float32) + fc1b_ref[...])
    h2 = _gelu(h2)
    h2 = (jnp.dot(h2.astype(CDT), fc2w_ref[...],
                  preferred_element_type=jnp.float32) + fc2b_ref[...])
    x = x + h2                                                       # residual 2
    x_ref[...] = x

    # ---- last layer: final LayerNorm on cls rows + lane-padded head ----------
    @pl.when(d == pl.num_programs(1) - 1)
    def _():
        cls = x.reshape(cb, NTOK_PAD, DIM)[:, 0:1, :].reshape(cb, DIM)   # 8-aligned
        cls = _layer_norm(cls, nw_ref[...], nb_ref[...])
        o_ref[...] = (jnp.dot(cls.astype(CDT), hw_ref[...],
                              preferred_element_type=jnp.float32)
                      + hb_ref[...])                                 # [cb, NCLS_PAD]


# ------------------------------- pallas_call wrapper ----------------------------

def vit_forward(x_nchw, params, cb=CHUNK_B):
    bsz = x_nchw.shape[0]
    assert bsz % cb == 0
    nchunks = bsz // cb

    # --- glue: im2col patch unfold (row-major patch order, matching timm
    # PatchEmbed flatten(2).transpose(1,2)), rows padded to NTOK_PAD per image
    # so every batch boundary is sublane-aligned; fed to the kernel in bf16.
    # TODO(synk): at real ViT-B dims fuse this unfold into the kernel by
    # BlockSpec-indexing the NCHW input per patch-row tile.
    xp = x_nchw.reshape(bsz, CIN, IMG // PATCH, PATCH, IMG // PATCH, PATCH)
    xp = xp.transpose(0, 2, 4, 1, 3, 5).reshape(bsz, NPATCH, CPP)
    xp_pad = jnp.zeros((bsz, NTOK_PAD, CPP), CDT)
    xp_pad = xp_pad.at[:, 1:NTOK, :].set(xp.astype(CDT))   # row 0 = cls slot, 5..7 pad
    xp_pad = xp_pad.reshape(bsz * NTOK_PAD, CPP)

    # static per-token bias: row0 = cls + pos[0]; rows 1..4 = pos + patch bias; pad = 0
    tok_bias = jnp.zeros((NTOK_PAD, DIM), jnp.float32)
    tok_bias = tok_bias.at[0:1].set(params['cls_token'] + params['pos_embed'][0:1])
    tok_bias = tok_bias.at[1:NTOK].set(params['pos_embed'][1:NTOK] + params['patch_b'])

    blk = params['blocks']
    args = (xp_pad, params['patch_w'], tok_bias,
            blk['ln1_w'], blk['ln1_b'], blk['qkv_w'], blk['qkv_b'],
            blk['proj_w'], blk['proj_b'], blk['ln2_w'], blk['ln2_b'],
            blk['fc1_w'], blk['fc1_b'], blk['fc2_w'], blk['fc2_b'],
            params['norm_w'], params['norm_b'],
            params['head_w'], params['head_b'])

    def const_spec(a):
        nd = a.ndim
        return pl.BlockSpec(a.shape, lambda b, d, nd=nd: (0,) * nd)

    def layer_spec(a):
        tail = a.shape[1:]
        # leading DEPTH axis streamed by the "arbitrary" grid axis (auto double-buffered)
        return pl.BlockSpec((None,) + tail,
                            lambda b, d, n=len(tail): (d,) + (0,) * n)

    in_specs = [
        pl.BlockSpec((cb * NTOK_PAD, CPP), lambda b, d: (b, 0)),     # patch rows / chunk
        const_spec(params['patch_w']),
        const_spec(tok_bias),
        layer_spec(blk['ln1_w']), layer_spec(blk['ln1_b']),
        layer_spec(blk['qkv_w']), layer_spec(blk['qkv_b']),
        layer_spec(blk['proj_w']), layer_spec(blk['proj_b']),
        layer_spec(blk['ln2_w']), layer_spec(blk['ln2_b']),
        layer_spec(blk['fc1_w']), layer_spec(blk['fc1_b']),
        layer_spec(blk['fc2_w']), layer_spec(blk['fc2_b']),
        const_spec(params['norm_w']), const_spec(params['norm_b']),
        const_spec(params['head_w']), const_spec(params['head_b']),
    ]

    logits_pad = pl.pallas_call(
        functools.partial(vit_kernel, cb),
        out_shape=jax.ShapeDtypeStruct((nchunks, cb, NCLS_PAD), jnp.float32),
        grid=(nchunks, DEPTH),
        in_specs=in_specs,
        out_specs=pl.BlockSpec((None, cb, NCLS_PAD), lambda b, d: (b, 0, 0)),
        scratch_shapes=[pltpu.VMEM((cb * NTOK_PAD, DIM), jnp.float32)],
        compiler_params=pltpu.CompilerParams(
            dimension_semantics=("parallel", "arbitrary"),
            vmem_limit_bytes=48 * 1024 * 1024),
    )(*args)

    return logits_pad.reshape(bsz, NCLS_PAD)[:, :NCLS]


# ---------------------------- deterministic parameters --------------------------

def init_params(key):
    ks = jax.random.split(key, 5)

    def nrm(k, shape):
        return 0.02 * jax.random.normal(k, shape, jnp.float32)

    # replaced classification head, zero-padded on the lane axis to NCLS_PAD
    head_w = jnp.zeros((DIM, NCLS_PAD), jnp.float32)
    head_w = head_w.at[:, :NCLS].set(nrm(ks[3], (DIM, NCLS)))

    params = {
        'patch_w': nrm(ks[0], (CPP, DIM)).astype(CDT),   # conv stem, flattened, bf16
        'patch_b': jnp.zeros((1, DIM), jnp.float32),
        'cls_token': nrm(ks[1], (1, DIM)),
        'pos_embed': nrm(ks[2], (NTOK, DIM)),
        'norm_w': jnp.ones((1, DIM), jnp.float32),
        'norm_b': jnp.zeros((1, DIM), jnp.float32),
        'head_w': head_w.astype(CDT),
        'head_b': jnp.zeros((1, NCLS_PAD), jnp.float32),
    }

    bk = jax.random.split(ks[4], DEPTH * 4)
    scale = HEAD_DIM ** -0.5

    def stack(fn):
        return jnp.stack([fn(d) for d in range(DEPTH)], axis=0)

    # fold attention scale into the q columns (weight + bias), then cast to bf16
    qkv_w = stack(lambda d: nrm(bk[4 * d + 0], (DIM, 3 * DIM)))
    qkv_w = qkv_w.at[:, :, :DIM].multiply(scale)
    qkv_b = jnp.zeros((DEPTH, 1, 3 * DIM), jnp.float32)
    qkv_b = qkv_b.at[:, :, :DIM].multiply(scale)

    params['blocks'] = {
        'ln1_w': jnp.ones((DEPTH, 1, DIM), jnp.float32),
        'ln1_b': jnp.zeros((DEPTH, 1, DIM), jnp.float32),
        'qkv_w': qkv_w.astype(CDT),
        'qkv_b': qkv_b,
        'proj_w': stack(lambda d: nrm(bk[4 * d + 1], (DIM, DIM))).astype(CDT),
        'proj_b': jnp.zeros((DEPTH, 1, DIM), jnp.float32),
        'ln2_w': jnp.ones((DEPTH, 1, DIM), jnp.float32),
        'ln2_b': jnp.zeros((DEPTH, 1, DIM), jnp.float32),
        'fc1_w': stack(lambda d: nrm(bk[4 * d + 2], (DIM, MLP))).astype(CDT),
        'fc1_b': jnp.zeros((DEPTH, 1, MLP), jnp.float32),
        'fc2_w': stack(lambda d: nrm(bk[4 * d + 3], (MLP, DIM))).astype(CDT),
        'fc2_b': jnp.zeros((DEPTH, 1, DIM), jnp.float32),
    }
    return params


if __name__ == "__main__":
    key = jax.random.PRNGKey(0)
    kx, kp = jax.random.split(key)

    # input consistent with the module's NCHW conv stem (small spatial size)
    x = jax.random.normal(kx, (2, CIN, IMG, IMG), jnp.float32)
    params = init_params(kp)

    logits = jax.jit(vit_forward)(x, params)
    jax.block_until_ready(logits)
    assert logits.shape == (2, NCLS) and logits.dtype == jnp.float32
    print("KERNEL_OK")
</pallas_src>

<mosaic_0001>
module attributes {stable_mosaic.version = 11 : i64} {
  func.func @vit_kernel(%arg0: i32, %arg1: i32, %arg2: memref<8x768xbf16, #tpu.memory_space<vmem>>, %arg3: memref<768x64xbf16, #tpu.memory_space<vmem>>, %arg4: memref<8x64xf32, #tpu.memory_space<vmem>>, %arg5: memref<1x1x64xf32, #tpu.memory_space<vmem>>, %arg6: memref<1x1x64xf32, #tpu.memory_space<vmem>>, %arg7: memref<1x64x192xbf16, #tpu.memory_space<vmem>>, %arg8: memref<1x1x192xf32, #tpu.memory_space<vmem>>, %arg9: memref<1x64x64xbf16, #tpu.memory_space<vmem>>, %arg10: memref<1x1x64xf32, #tpu.memory_space<vmem>>, %arg11: memref<1x1x64xf32, #tpu.memory_space<vmem>>, %arg12: memref<1x1x64xf32, #tpu.memory_space<vmem>>, %arg13: memref<1x64x256xbf16, #tpu.memory_space<vmem>>, %arg14: memref<1x1x256xf32, #tpu.memory_space<vmem>>, %arg15: memref<1x256x64xbf16, #tpu.memory_space<vmem>>, %arg16: memref<1x1x64xf32, #tpu.memory_space<vmem>>, %arg17: memref<1x64xf32, #tpu.memory_space<vmem>>, %arg18: memref<1x64xf32, #tpu.memory_space<vmem>>, %arg19: memref<64x128xbf16, #tpu.memory_space<vmem>>, %arg20: memref<1x128xf32, #tpu.memory_space<vmem>>, %arg21: memref<1x1x128xf32, #tpu.memory_space<vmem>>, %arg22: memref<8x64xf32, #tpu.memory_space<vmem>>) attributes {dimension_semantics = [#tpu.dimension_semantics<parallel>, #tpu.dimension_semantics<arbitrary>], iteration_bounds = array<i64: 2, 2>, scalar_prefetch = 0 : i64, scratch_operands = 1 : i64, tpu.core_type = #tpu.core_type<tc>, window_params = [{transform_indices = @transform_0, window_bounds = array<i64: 8, 768>}, {pipeline_mode = #tpu.pipeline_mode<synchronous>, transform_indices = @transform_1, window_bounds = array<i64: 768, 64>}, {pipeline_mode = #tpu.pipeline_mode<synchronous>, transform_indices = @transform_2, window_bounds = array<i64: 8, 64>}, {transform_indices = @transform_3, window_bounds = array<i64: 1, 1, 64>}, {transform_indices = @transform_4, window_bounds = array<i64: 1, 1, 64>}, {transform_indices = @transform_5, window_bounds = array<i64: 1, 64, 192>}, {transform_indices = @transform_6, window_bounds = array<i64: 1, 1, 192>}, {transform_indices = @transform_7, window_bounds = array<i64: 1, 64, 64>}, {transform_indices = @transform_8, window_bounds = array<i64: 1, 1, 64>}, {transform_indices = @transform_9, window_bounds = array<i64: 1, 1, 64>}, {transform_indices = @transform_10, window_bounds = array<i64: 1, 1, 64>}, {transform_indices = @transform_11, window_bounds = array<i64: 1, 64, 256>}, {transform_indices = @transform_12, window_bounds = array<i64: 1, 1, 256>}, {transform_indices = @transform_13, window_bounds = array<i64: 1, 256, 64>}, {transform_indices = @transform_14, window_bounds = array<i64: 1, 1, 64>}, {pipeline_mode = #tpu.pipeline_mode<synchronous>, transform_indices = @transform_15, window_bounds = array<i64: 1, 64>}, {pipeline_mode = #tpu.pipeline_mode<synchronous>, transform_indices = @transform_16, window_bounds = array<i64: 1, 64>}, {pipeline_mode = #tpu.pipeline_mode<synchronous>, transform_indices = @transform_17, window_bounds = array<i64: 64, 128>}, {pipeline_mode = #tpu.pipeline_mode<synchronous>, transform_indices = @transform_18, window_bounds = array<i64: 1, 128>}, {transform_indices = @transform_19, window_bounds = array<i64: 1, 1, 128>}]} {
    %c0_i32 = arith.constant 0 : i32
    %0 = arith.cmpi eq, %arg1, %c0_i32 : i32
    %1 = arith.extui %0 : i1 to i32
    %c0_i32_0 = arith.constant 0 : i32
    %2 = arith.cmpi ne, %1, %c0_i32_0 : i32
    scf.if %2 {
      %c0_63 = arith.constant 0 : index
      %c0_64 = arith.constant 0 : index
      %153 = vector.load %arg2[%c0_63, %c0_64] : memref<8x768xbf16, #tpu.memory_space<vmem>>, vector<8x768xbf16>
      %c0_65 = arith.constant 0 : index
      %c0_66 = arith.constant 0 : index
      %154 = vector.load %arg3[%c0_65, %c0_66] : memref<768x64xbf16, #tpu.memory_space<vmem>>, vector<768x64xbf16>
      %cst_67 = arith.constant dense<0.000000e+00> : vector<8x64xf32>
      %155 = tpu.matmul %153, %154, %cst_67 {dimension_numbers = #tpu.dot_dimension_numbers<[1], [0], [0], [1], [0, 0, 1, 1], [], []>} : vector<8x768xbf16>, vector<768x64xbf16>, vector<8x64xf32> -> vector<8x64xf32>
      %156 = vector.shape_cast %155 : vector<8x64xf32> to vector<1x8x64xf32>
      %c0_68 = arith.constant 0 : index
      %c0_69 = arith.constant 0 : index
      %157 = vector.load %arg4[%c0_68, %c0_69] : memref<8x64xf32, #tpu.memory_space<vmem>>, vector<8x64xf32>
      %158 = vector.shape_cast %157 : vector<8x64xf32> to vector<1x8x64xf32>
      %159 = arith.addf %156, %158 : vector<1x8x64xf32>
      %160 = vector.shape_cast %159 : vector<1x8x64xf32> to vector<8x64xf32>
      %c0_70 = arith.constant 0 : index
      %c0_71 = arith.constant 0 : index
      %161 = vector.load %arg22[%c0_70, %c0_71] : memref<8x64xf32, #tpu.memory_space<vmem>>, vector<8x64xf32>
      tpu.vector_store %arg22[%c0_70, %c0_71], %160 {strides = array<i32>} : memref<8x64xf32, #tpu.memory_space<vmem>>, vector<8x64xf32>,
    } else {
    }
    %c0 = arith.constant 0 : index
    %c0_1 = arith.constant 0 : index
    %3 = vector.load %arg22[%c0, %c0_1] : memref<8x64xf32, #tpu.memory_space<vmem>>, vector<8x64xf32>
    %4 = tpu.iota {dimensions = array<i32: 2>} : vector<1x1x8xi32>
    %c5_i32 = arith.constant 5 : i32
    %5 = vector.broadcast %c5_i32 : i32 to vector<1x1x8xi32>
    %6 = arith.cmpi slt, %4, %5 : vector<1x1x8xi32>
    %cst = arith.constant 0.000000e+00 : f32
    %cst_2 = arith.constant -1.000000e+30 : f32
    %7 = vector.broadcast %cst : f32 to vector<1x1x8xf32>
    %8 = vector.broadcast %cst_2 : f32 to vector<1x1x8xf32>
    %9 = arith.select %6, %7, %8 : vector<1x1x8xi1>, vector<1x1x8xf32>
    %c0_3 = arith.constant 0 : index
    %c0_4 = arith.constant 0 : index
    %c0_5 = arith.constant 0 : index
    %10 = vector.load %arg5[%c0_3, %c0_4, %c0_5] : memref<1x1x64xf32, #tpu.memory_space<vmem>>, vector<1x1x64xf32>
    %11 = vector.shape_cast %10 : vector<1x1x64xf32> to vector<1x64xf32>
    %c0_6 = arith.constant 0 : index
    %c0_7 = arith.constant 0 : index
    %c0_8 = arith.constant 0 : index
    %12 = vector.load %arg6[%c0_6, %c0_7, %c0_8] : memref<1x1x64xf32, #tpu.memory_space<vmem>>, vector<1x1x64xf32>
    %13 = vector.shape_cast %12 : vector<1x1x64xf32> to vector<1x64xf32>
    %cst_9 = arith.constant dense<0.000000e+00> : vector<8xf32>
    %14 = vector.multi_reduction <add>, %3, %cst_9 [1] : vector<8x64xf32> to vector<8xf32>
    %15 = vector.shape_cast %14 : vector<8xf32> to vector<8x1xf32>
    %cst_10 = arith.constant 6.400000e+01 : f32
    %16 = vector.broadcast %cst_10 : f32 to vector<8x1xf32>
    %17 = arith.divf %15, %16 : vector<8x1xf32>
    %18 = vector.broadcast %17 : vector<8x1xf32> to vector<8x64xf32>
    %19 = arith.subf %3, %18 : vector<8x64xf32>
    %20 = arith.mulf %19, %19 : vector<8x64xf32>
    %cst_11 = arith.constant dense<0.000000e+00> : vector<8xf32>
    %21 = vector.multi_reduction <add>, %20, %cst_11 [1] : vector<8x64xf32> to vector<8xf32>
    %22 = vector.shape_cast %21 : vector<8xf32> to vector<8x1xf32>
    %cst_12 = arith.constant 6.400000e+01 : f32
    %23 = vector.broadcast %cst_12 : f32 to vector<8x1xf32>
    %24 = arith.divf %22, %23 : vector<8x1xf32>
    %25 = vector.broadcast %17 : vector<8x1xf32> to vector<8x64xf32>
    %26 = arith.subf %3, %25 : vector<8x64xf32>
    %cst_13 = arith.constant 9.99999997E-7 : f32
    %27 = vector.broadcast %cst_13 : f32 to vector<8x1xf32>
    %28 = arith.addf %24, %27 : vector<8x1xf32>
    %29 = math.rsqrt %28 : vector<8x1xf32>
    %30 = vector.broadcast %29 : vector<8x1xf32> to vector<8x64xf32>
    %31 = arith.mulf %26, %30 : vector<8x64xf32>
    %32 = vector.broadcast %11 : vector<1x64xf32> to vector<8x64xf32>
    %33 = arith.mulf %31, %32 : vector<8x64xf32>
    %34 = vector.broadcast %13 : vector<1x64xf32> to vector<8x64xf32>
    %35 = arith.addf %33, %34 : vector<8x64xf32>
    %36 = arith.truncf %35 : vector<8x64xf32> to vector<8x64xbf16>
    %c0_14 = arith.constant 0 : index
    %c0_15 = arith.constant 0 : index
    %c0_16 = arith.constant 0 : index
    %37 = vector.load %arg7[%c0_14, %c0_15, %c0_16] : memref<1x64x192xbf16, #tpu.memory_space<vmem>>, vector<1x64x192xbf16>
    %38 = vector.shape_cast %37 : vector<1x64x192xbf16> to vector<64x192xbf16>
    %cst_17 = arith.constant dense<0.000000e+00> : vector<8x192xf32>
    %39 = tpu.matmul %36, %38, %cst_17 {dimension_numbers = #tpu.dot_dimension_numbers<[1], [0], [0], [1], [0, 0, 1, 1], [], []>} : vector<8x64xbf16>, vector<64x192xbf16>, vector<8x192xf32> -> vector<8x192xf32>
    %c0_18 = arith.constant 0 : index
    %c0_19 = arith.constant 0 : index
    %c0_20 = arith.constant 0 : index
    %40 = vector.load %arg8[%c0_18, %c0_19, %c0_20] : memref<1x1x192xf32, #tpu.memory_space<vmem>>, vector<1x1x192xf32>
    %41 = vector.shape_cast %40 : vector<1x1x192xf32> to vector<1x192xf32>
    %42 = vector.broadcast %41 : vector<1x192xf32> to vector<8x192xf32>
    %43 = arith.addf %39, %42 : vector<8x192xf32>
    %44 = vector.extract_strided_slice %43 {offsets = [0, 0], sizes = [8, 64], strides = [1, 1]} : vector<8x192xf32> to vector<8x64xf32>
    %45 = vector.shape_cast %44 : vector<8x64xf32> to vector<1x8x64xf32>
    %46 = vector.extract_strided_slice %45 {offsets = [0, 0, 0], sizes = [1, 8, 16], strides = [1, 1, 1]} : vector<1x8x64xf32> to vector<1x8x16xf32>
    %47 = vector.extract_strided_slice %45 {offsets = [0, 0, 16], sizes = [1, 8, 16], strides = [1, 1, 1]} : vector<1x8x64xf32> to vector<1x8x16xf32>
    %48 = vector.extract_strided_slice %45 {offsets = [0, 0, 32], sizes = [1, 8, 16], strides = [1, 1, 1]} : vector<1x8x64xf32> to vector<1x8x16xf32>
    %49 = vector.extract_strided_slice %45 {offsets = [0, 0, 48], sizes = [1, 8, 16], strides = [1, 1, 1]} : vector<1x8x64xf32> to vector<1x8x16xf32>
    %50 = tpu.concatenate %46, %47, %48, %49 in 0 : vector<1x8x16xf32>, vector<1x8x16xf32>, vector<1x8x16xf32>, vector<1x8x16xf32> -> vector<4x8x16xf32>
    %51 = arith.truncf %50 : vector<4x8x16xf32> to vector<4x8x16xbf16>
    %52 = vector.extract_strided_slice %43 {offsets = [0, 64], sizes = [8, 64], strides = [1, 1]} : vector<8x192xf32> to vector<8x64xf32>
    %53 = vector.shape_cast %52 : vector<8x64xf32> to vector<1x8x64xf32>
    %54 = vector.extract_strided_slice %53 {offsets = [0, 0, 0], sizes = [1, 8, 16], strides = [1, 1, 1]} : vector<1x8x64xf32> to vector<1x8x16xf32>
    %55 = vector.extract_strided_slice %53 {offsets = [0, 0, 16], sizes = [1, 8, 16], strides = [1, 1, 1]} : vector<1x8x64xf32> to vector<1x8x16xf32>
    %56 = vector.extract_strided_slice %53 {offsets = [0, 0, 32], sizes = [1, 8, 16], strides = [1, 1, 1]} : vector<1x8x64xf32> to vector<1x8x16xf32>
    %57 = vector.extract_strided_slice %53 {offsets = [0, 0, 48], sizes = [1, 8, 16], strides = [1, 1, 1]} : vector<1x8x64xf32> to vector<1x8x16xf32>
    %58 = tpu.concatenate %54, %55, %56, %57 in 0 : vector<1x8x16xf32>, vector<1x8x16xf32>, vector<1x8x16xf32>, vector<1x8x16xf32> -> vector<4x8x16xf32>
    %59 = arith.truncf %58 : vector<4x8x16xf32> to vector<4x8x16xbf16>
    %60 = vector.extract_strided_slice %43 {offsets = [0, 128], sizes = [8, 64], strides = [1, 1]} : vector<8x192xf32> to vector<8x64xf32>
    %61 = vector.shape_cast %60 : vector<8x64xf32> to vector<1x8x64xf32>
    %62 = vector.extract_strided_slice %61 {offsets = [0, 0, 0], sizes = [1, 8, 16], strides = [1, 1, 1]} : vector<1x8x64xf32> to vector<1x8x16xf32>
    %63 = vector.extract_strided_slice %61 {offsets = [0, 0, 16], sizes = [1, 8, 16], strides = [1, 1, 1]} : vector<1x8x64xf32> to vector<1x8x16xf32>
    %64 = vector.extract_strided_slice %61 {offsets = [0, 0, 32], sizes = [1, 8, 16], strides = [1, 1, 1]} : vector<1x8x64xf32> to vector<1x8x16xf32>
    %65 = vector.extract_strided_slice %61 {offsets = [0, 0, 48], sizes = [1, 8, 16], strides = [1, 1, 1]} : vector<1x8x64xf32> to vector<1x8x16xf32>
    %66 = tpu.concatenate %62, %63, %64, %65 in 0 : vector<1x8x16xf32>, vector<1x8x16xf32>, vector<1x8x16xf32>, vector<1x8x16xf32> -> vector<4x8x16xf32>
    %67 = arith.truncf %66 : vector<4x8x16xf32> to vector<4x8x16xbf16>
    "tpu.trace_start"() <{level = 10 : i32, message = "bqd,bkd->bqk"}> : () -> ()
    %cst_21 = arith.constant dense<0.000000e+00> : vector<4x8x8xf32>
    %68 = tpu.matmul %51, %59, %cst_21 {dimension_numbers = #tpu.dot_dimension_numbers<[2], [2], [1], [1], [0, 0, 0, 1, 1, 1], [0], [0]>} : vector<4x8x16xbf16>, vector<4x8x16xbf16>, vector<4x8x8xf32> -> vector<4x8x8xf32>
    "tpu.trace_stop"() : () -> ()
    %69 = vector.broadcast %9 : vector<1x1x8xf32> to vector<4x8x8xf32>
    %70 = arith.addf %68, %69 : vector<4x8x8xf32>
    %cst_22 = arith.constant dense<0xFF800000> : vector<4x8xf32>
    %71 = vector.multi_reduction <maximumf>, %70, %cst_22 [2] : vector<4x8x8xf32> to vector<4x8xf32>
    %72 = vector.shape_cast %71 : vector<4x8xf32> to vector<4x8x1xf32>
    %73 = vector.broadcast %72 : vector<4x8x1xf32> to vector<4x8x8xf32>
    %74 = arith.subf %70, %73 : vector<4x8x8xf32>
    %75 = math.exp %74 : vector<4x8x8xf32>
    %cst_23 = arith.constant dense<0.000000e+00> : vector<4x8xf32>
    %76 = vector.multi_reduction <add>, %75, %cst_23 [2] : vector<4x8x8xf32> to vector<4x8xf32>
    %77 = vector.shape_cast %76 : vector<4x8xf32> to vector<4x8x1xf32>
    %78 = tpu.reciprocal %77 {approx = true} : vector<4x8x1xf32> -> vector<4x8x1xf32>
    %79 = vector.broadcast %78 : vector<4x8x1xf32> to vector<4x8x8xf32>
    %80 = arith.mulf %75, %79 : vector<4x8x8xf32>
    %81 = arith.truncf %80 : vector<4x8x8xf32> to vector<4x8x8xbf16>
    "tpu.trace_start"() <{level = 10 : i32, message = "bqk,bkd->bqd"}> : () -> ()
    %cst_24 = arith.constant dense<0.000000e+00> : vector<4x8x16xf32>
    %82 = tpu.matmul %81, %67, %cst_24 {dimension_numbers = #tpu.dot_dimension_numbers<[2], [1], [1], [2], [0, 0, 0, 1, 1, 2], [0], [0]>} : vector<4x8x8xbf16>, vector<4x8x16xbf16>, vector<4x8x16xf32> -> vector<4x8x16xf32>
    "tpu.trace_stop"() : () -> ()
    %83 = vector.extract_strided_slice %82 {offsets = [0, 0, 0], sizes = [1, 8, 16], strides = [1, 1, 1]} : vector<4x8x16xf32> to vector<1x8x16xf32>
    %84 = vector.extract_strided_slice %82 {offsets = [1, 0, 0], sizes = [1, 8, 16], strides = [1, 1, 1]} : vector<4x8x16xf32> to vector<1x8x16xf32>
    %85 = vector.extract_strided_slice %82 {offsets = [2, 0, 0], sizes = [1, 8, 16], strides = [1, 1, 1]} : vector<4x8x16xf32> to vector<1x8x16xf32>
    %86 = vector.extract_strided_slice %82 {offsets = [3, 0, 0], sizes = [1, 8, 16], strides = [1, 1, 1]} : vector<4x8x16xf32> to vector<1x8x16xf32>
    %87 = tpu.concatenate %83, %84, %85, %86 in 2 : vector<1x8x16xf32>, vector<1x8x16xf32>, vector<1x8x16xf32>, vector<1x8x16xf32> -> vector<1x8x64xf32>
    %88 = vector.shape_cast %87 : vector<1x8x64xf32> to vector<8x64xf32>
    %89 = arith.truncf %88 : vector<8x64xf32> to vector<8x64xbf16>
    %c0_25 = arith.constant 0 : index
    %c0_26 = arith.constant 0 : index
    %c0_27 = arith.constant 0 : index
    %90 = vector.load %arg9[%c0_25, %c0_26, %c0_27] : memref<1x64x64xbf16, #tpu.memory_space<vmem>>, vector<1x64x64xbf16>
    %91 = vector.shape_cast %90 : vector<1x64x64xbf16> to vector<64x64xbf16>
    %cst_28 = arith.constant dense<0.000000e+00> : vector<8x64xf32>
    %92 = tpu.matmul %89, %91, %cst_28 {dimension_numbers = #tpu.dot_dimension_numbers<[1], [0], [0], [1], [0, 0, 1, 1], [], []>} : vector<8x64xbf16>, vector<64x64xbf16>, vector<8x64xf32> -> vector<8x64xf32>
    %c0_29 = arith.constant 0 : index
    %c0_30 = arith.constant 0 : index
    %c0_31 = arith.constant 0 : index
    %93 = vector.load %arg10[%c0_29, %c0_30, %c0_31] : memref<1x1x64xf32, #tpu.memory_space<vmem>>, vector<1x1x64xf32>
    %94 = vector.shape_cast %93 : vector<1x1x64xf32> to vector<1x64xf32>
    %95 = vector.broadcast %94 : vector<1x64xf32> to vector<8x64xf32>
    %96 = arith.addf %92, %95 : vector<8x64xf32>
    %97 = arith.addf %3, %96 : vector<8x64xf32>
    %c0_32 = arith.constant 0 : index
    %c0_33 = arith.constant 0 : index
    %c0_34 = arith.constant 0 : index
    %98 = vector.load %arg11[%c0_32, %c0_33, %c0_34] : memref<1x1x64xf32, #tpu.memory_space<vmem>>, vector<1x1x64xf32>
    %99 = vector.shape_cast %98 : vector<1x1x64xf32> to vector<1x64xf32>
    %c0_35 = arith.constant 0 : index
    %c0_36 = arith.constant 0 : index
    %c0_37 = arith.constant 0 : index
    %100 = vector.load %arg12[%c0_35, %c0_36, %c0_37] : memref<1x1x64xf32, #tpu.memory_space<vmem>>, vector<1x1x64xf32>
    %101 = vector.shape_cast %100 : vector<1x1x64xf32> to vector<1x64xf32>
    %cst_38 = arith.constant dense<0.000000e+00> : vector<8xf32>
    %102 = vector.multi_reduction <add>, %97, %cst_38 [1] : vector<8x64xf32> to vector<8xf32>
    %103 = vector.shape_cast %102 : vector<8xf32> to vector<8x1xf32>
    %cst_39 = arith.constant 6.400000e+01 : f32
    %104 = vector.broadcast %cst_39 : f32 to vector<8x1xf32>
    %105 = arith.divf %103, %104 : vector<8x1xf32>
    %106 = vector.broadcast %105 : vector<8x1xf32> to vector<8x64xf32>
    %107 = arith.subf %97, %106 : vector<8x64xf32>
    %108 = arith.mulf %107, %107 : vector<8x64xf32>
    %cst_40 = arith.constant dense<0.000000e+00> : vector<8xf32>
    %109 = vector.multi_reduction <add>, %108, %cst_40 [1] : vector<8x64xf32> to vector<8xf32>
    %110 = vector.shape_cast %109 : vector<8xf32> to vector<8x1xf32>
    %cst_41 = arith.constant 6.400000e+01 : f32
    %111 = vector.broadcast %cst_41 : f32 to vector<8x1xf32>
    %112 = arith.divf %110, %111 : vector<8x1xf32>
    %113 = vector.broadcast %105 : vector<8x1xf32> to vector<8x64xf32>
    %114 = arith.subf %97, %113 : vector<8x64xf32>
    %cst_42 = arith.constant 9.99999997E-7 : f32
    %115 = vector.broadcast %cst_42 : f32 to vector<8x1xf32>
    %116 = arith.addf %112, %115 : vector<8x1xf32>
    %117 = math.rsqrt %116 : vector<8x1xf32>
    %118 = vector.broadcast %117 : vector<8x1xf32> to vector<8x64xf32>
    %119 = arith.mulf %114, %118 : vector<8x64xf32>
    %120 = vector.broadcast %99 : vector<1x64xf32> to vector<8x64xf32>
    %121 = arith.mulf %119, %120 : vector<8x64xf32>
    %122 = vector.broadcast %101 : vector<1x64xf32> to vector<8x64xf32>
    %123 = arith.addf %121, %122 : vector<8x64xf32>
    %124 = arith.truncf %123 : vector<8x64xf32> to vector<8x64xbf16>
    %c0_43 = arith.constant 0 : index
    %c0_44 = arith.constant 0 : index
    %c0_45 = arith.constant 0 : index
    %125 = vector.load %arg13[%c0_43, %c0_44, %c0_45] : memref<1x64x256xbf16, #tpu.memory_space<vmem>>, vector<1x64x256xbf16>
    %126 = vector.shape_cast %125 : vector<1x64x256xbf16> to vector<64x256xbf16>
    %cst_46 = arith.constant dense<0.000000e+00> : vector<8x256xf32>
    %127 = tpu.matmul %124, %126, %cst_46 {dimension_numbers = #tpu.dot_dimension_numbers<[1], [0], [0], [1], [0, 0, 1, 1], [], []>} : vector<8x64xbf16>, vector<64x256xbf16>, vector<8x256xf32> -> vector<8x256xf32>
    %c0_47 = arith.constant 0 : index
    %c0_48 = arith.constant 0 : index
    %c0_49 = arith.constant 0 : index
    %128 = vector.load %arg14[%c0_47, %c0_48, %c0_49] : memref<1x1x256xf32, #tpu.memory_space<vmem>>, vector<1x1x256xf32>
    %129 = vector.shape_cast %128 : vector<1x1x256xf32> to vector<1x256xf32>
    %130 = vector.broadcast %129 : vector<1x256xf32> to vector<8x256xf32>
    %131 = arith.addf %127, %130 : vector<8x256xf32>
    %cst_50 = arith.constant 5.000000e-01 : f32
    %132 = vector.broadcast %cst_50 : f32 to vector<8x256xf32>
    %133 = arith.mulf %132, %131 : vector<8x256xf32>
    %cst_51 = arith.constant 0.707106769 : f32
    %134 = vector.broadcast %cst_51 : f32 to vector<8x256xf32>
    %135 = arith.mulf %131, %134 : vector<8x256xf32>
    %136 = math.erf %135 : vector<8x256xf32>
    %cst_52 = arith.constant 1.000000e+00 : f32
    %137 = vector.broadcast %cst_52 : f32 to vector<8x256xf32>
    %138 = arith.addf %137, %136 : vector<8x256xf32>
    %139 = arith.mulf %133, %138 : vector<8x256xf32>
    %140 = arith.truncf %139 : vector<8x256xf32> to vector<8x256xbf16>
    %c0_53 = arith.constant 0 : index
    %c0_54 = arith.constant 0 : index
    %c0_55 = arith.constant 0 : index
    %141 = vector.load %arg15[%c0_53, %c0_54, %c0_55] : memref<1x256x64xbf16, #tpu.memory_space<vmem>>, vector<1x256x64xbf16>
    %142 = vector.shape_cast %141 : vector<1x256x64xbf16> to vector<256x64xbf16>
    %cst_56 = arith.constant dense<0.000000e+00> : vector<8x64xf32>
    %143 = tpu.matmul %140, %142, %cst_56 {dimension_numbers = #tpu.dot_dimension_numbers<[1], [0], [0], [1], [0, 0, 1, 1], [], []>} : vector<8x256xbf16>, vector<256x64xbf16>, vector<8x64xf32> -> vector<8x64xf32>
    %c0_57 = arith.constant 0 : index
    %c0_58 = arith.constant 0 : index
    %c0_59 = arith.constant 0 : index
    %144 = vector.load %arg16[%c0_57, %c0_58, %c0_59] : memref<1x1x64xf32, #tpu.memory_space<vmem>>, vector<1x1x64xf32>
    %145 = vector.shape_cast %144 : vector<1x1x64xf32> to vector<1x64xf32>
    %146 = vector.broadcast %145 : vector<1x64xf32> to vector<8x64xf32>
    %147 = arith.addf %143, %146 : vector<8x64xf32>
    %148 = arith.addf %97, %147 : vector<8x64xf32>
    %c0_60 = arith.constant 0 : index
    %c0_61 = arith.constant 0 : index
    %149 = vector.load %arg22[%c0_60, %c0_61] : memref<8x64xf32, #tpu.memory_space<vmem>>, vector<8x64xf32>
    tpu.vector_store %arg22[%c0_60, %c0_61], %148 {strides = array<i32>} : memref<8x64xf32, #tpu.memory_space<vmem>>, vector<8x64xf32>,
    %c1_i32 = arith.constant 1 : i32
    %150 = arith.cmpi eq, %arg1, %c1_i32 : i32
    %151 = arith.extui %150 : i1 to i32
    %c0_i32_62 = arith.constant 0 : i32
    %152 = arith.cmpi ne, %151, %c0_i32_62 : i32
    scf.if %152 {
      %153 = vector.shape_cast %148 : vector<8x64xf32> to vector<1x8x64xf32>
      %154 = vector.extract_strided_slice %153 {offsets = [0, 0, 0], sizes = [1, 1, 64], strides = [1, 1, 1]} : vector<1x8x64xf32> to vector<1x1x64xf32>
      %155 = vector.shape_cast %154 : vector<1x1x64xf32> to vector<1x64xf32>
      %c0_63 = arith.constant 0 : index
      %c0_64 = arith.constant 0 : index
      %156 = vector.load %arg17[%c0_63, %c0_64] : memref<1x64xf32, #tpu.memory_space<vmem>>, vector<1x64xf32>
      %c0_65 = arith.constant 0 : index
      %c0_66 = arith.constant 0 : index
      %157 = vector.load %arg18[%c0_65, %c0_66] : memref<1x64xf32, #tpu.memory_space<vmem>>, vector<1x64xf32>
      %cst_67 = arith.constant dense<0.000000e+00> : vector<1xf32>
      %158 = vector.multi_reduction <add>, %155, %cst_67 [1] : vector<1x64xf32> to vector<1xf32>
      %159 = vector.shape_cast %158 : vector<1xf32> to vector<1x1xf32>
      %cst_68 = arith.constant 6.400000e+01 : f32
      %160 = vector.broadcast %cst_68 : f32 to vector<1x1xf32>
      %161 = arith.divf %159, %160 : vector<1x1xf32>
      %162 = vector.broadcast %161 : vector<1x1xf32> to vector<1x64xf32>
      %163 = arith.subf %155, %162 : vector<1x64xf32>
      %164 = arith.mulf %163, %163 : vector<1x64xf32>
      %cst_69 = arith.constant dense<0.000000e+00> : vector<1xf32>
      %165 = vector.multi_reduction <add>, %164, %cst_69 [1] : vector<1x64xf32> to vector<1xf32>
      %166 = vector.shape_cast %165 : vector<1xf32> to vector<1x1xf32>
      %cst_70 = arith.constant 6.400000e+01 : f32
      %167 = vector.broadcast %cst_70 : f32 to vector<1x1xf32>
      %168 = arith.divf %166, %167 : vector<1x1xf32>
      %169 = vector.broadcast %161 : vector<1x1xf32> to vector<1x64xf32>
      %170 = arith.subf %155, %169 : vector<1x64xf32>
      %cst_71 = arith.constant 9.99999997E-7 : f32
      %171 = vector.broadcast %cst_71 : f32 to vector<1x1xf32>
      %172 = arith.addf %168, %171 : vector<1x1xf32>
      %173 = math.rsqrt %172 : vector<1x1xf32>
      %174 = vector.broadcast %173 : vector<1x1xf32> to vector<1x64xf32>
      %175 = arith.mulf %170, %174 : vector<1x64xf32>
      %176 = arith.mulf %175, %156 : vector<1x64xf32>
      %177 = arith.addf %176, %157 : vector<1x64xf32>
      %178 = arith.truncf %177 : vector<1x64xf32> to vector<1x64xbf16>
      %c0_72 = arith.constant 0 : index
      %c0_73 = arith.constant 0 : index
      %179 = vector.load %arg19[%c0_72, %c0_73] : memref<64x128xbf16, #tpu.memory_space<vmem>>, vector<64x128xbf16>
      %cst_74 = arith.constant dense<0.000000e+00> : vector<1x128xf32>
      %180 = tpu.matmul %178, %179, %cst_74 {dimension_numbers = #tpu.dot_dimension_numbers<[1], [0], [0], [1], [0, 0, 1, 1], [], []>} : vector<1x64xbf16>, vector<64x128xbf16>, vector<1x128xf32> -> vector<1x128xf32>
      %c0_75 = arith.constant 0 : index
      %c0_76 = arith.constant 0 : index
      %181 = vector.load %arg20[%c0_75, %c0_76] : memref<1x128xf32, #tpu.memory_space<vmem>>, vector<1x128xf32>
      %182 = arith.addf %180, %181 : vector<1x128xf32>
      %c0_77 = arith.constant 0 : index
      %c0_78 = arith.constant 0 : index
      %c0_79 = arith.constant 0 : index
      %183 = vector.load %arg21[%c0_77, %c0_78, %c0_79] : memref<1x1x128xf32, #tpu.memory_space<vmem>>, vector<1x1x128xf32>
      %184 = vector.shape_cast %183 : vector<1x1x128xf32> to vector<1x128xf32>
      %185 = vector.shape_cast %182 : vector<1x128xf32> to vector<1x1x128xf32>
      tpu.vector_store %arg21[%c0_77, %c0_78, %c0_79], %185 {strides = array<i32>} : memref<1x1x128xf32, #tpu.memory_space<vmem>>, vector<1x1x128xf32>,
    } else {
    }
    return
  }
  func.func @transform_0(%arg0: i32, %arg1: i32) -> (i32, i32) {
    %c0_i32 = arith.constant 0 : i32
    %c0_i32_0 = arith.constant 0 : i32
    return %arg0, %c0_i32 : i32, i32
  }
  func.func @transform_1(%arg0: i32, %arg1: i32) -> (i32, i32) {
    %c0_i32 = arith.constant 0 : i32
    %c0_i32_0 = arith.constant 0 : i32
    %c0_i32_1 = arith.constant 0 : i32
    return %c0_i32, %c0_i32_0 : i32, i32
  }
  func.func @transform_2(%arg0: i32, %arg1: i32) -> (i32, i32) {
    %c0_i32 = arith.constant 0 : i32
    %c0_i32_0 = arith.constant 0 : i32
    %c0_i32_1 = arith.constant 0 : i32
    return %c0_i32, %c0_i32_0 : i32, i32
  }
  func.func @transform_3(%arg0: i32, %arg1: i32) -> (i32, i32, i32) {
    %c0_i32 = arith.constant 0 : i32
    %c0_i32_0 = arith.constant 0 : i32
    %c0_i32_1 = arith.constant 0 : i32
    return %arg1, %c0_i32, %c0_i32_0 : i32, i32, i32
  }
  func.func @transform_4(%arg0: i32, %arg1: i32) -> (i32, i32, i32) {
    %c0_i32 = arith.constant 0 : i32
    %c0_i32_0 = arith.constant 0 : i32
    %c0_i32_1 = arith.constant 0 : i32
    return %arg1, %c0_i32, %c0_i32_0 : i32, i32, i32
  }
  func.func @transform_5(%arg0: i32, %arg1: i32) -> (i32, i32, i32) {
    %c0_i32 = arith.constant 0 : i32
    %c0_i32_0 = arith.constant 0 : i32
    %c0_i32_1 = arith.constant 0 : i32
    return %arg1, %c0_i32, %c0_i32_0 : i32, i32, i32
  }
  func.func @transform_6(%arg0: i32, %arg1: i32) -> (i32, i32, i32) {
    %c0_i32 = arith.constant 0 : i32
    %c0_i32_0 = arith.constant 0 : i32
    %c0_i32_1 = arith.constant 0 : i32
    return %arg1, %c0_i32, %c0_i32_0 : i32, i32, i32
  }
  func.func @transform_7(%arg0: i32, %arg1: i32) -> (i32, i32, i32) {
    %c0_i32 = arith.constant 0 : i32
    %c0_i32_0 = arith.constant 0 : i32
    %c0_i32_1 = arith.constant 0 : i32
    return %arg1, %c0_i32, %c0_i32_0 : i32, i32, i32
  }
  func.func @transform_8(%arg0: i32, %arg1: i32) -> (i32, i32, i32) {
    %c0_i32 = arith.constant 0 : i32
    %c0_i32_0 = arith.constant 0 : i32
    %c0_i32_1 = arith.constant 0 : i32
    return %arg1, %c0_i32, %c0_i32_0 : i32, i32, i32
  }
  func.func @transform_9(%arg0: i32, %arg1: i32) -> (i32, i32, i32) {
    %c0_i32 = arith.constant 0 : i32
    %c0_i32_0 = arith.constant 0 : i32
    %c0_i32_1 = arith.constant 0 : i32
    return %arg1, %c0_i32, %c0_i32_0 : i32, i32, i32
  }
  func.func @transform_10(%arg0: i32, %arg1: i32) -> (i32, i32, i32) {
    %c0_i32 = arith.constant 0 : i32
    %c0_i32_0 = arith.constant 0 : i32
    %c0_i32_1 = arith.constant 0 : i32
    return %arg1, %c0_i32, %c0_i32_0 : i32, i32, i32
  }
  func.func @transform_11(%arg0: i32, %arg1: i32) -> (i32, i32, i32) {
    %c0_i32 = arith.constant 0 : i32
    %c0_i32_0 = arith.constant 0 : i32
    %c0_i32_1 = arith.constant 0 : i32
    return %arg1, %c0_i32, %c0_i32_0 : i32, i32, i32
  }
  func.func @transform_12(%arg0: i32, %arg1: i32) -> (i32, i32, i32) {
    %c0_i32 = arith.constant 0 : i32
    %c0_i32_0 = arith.constant 0 : i32
    %c0_i32_1 = arith.constant 0 : i32
    return %arg1, %c0_i32, %c0_i32_0 : i32, i32, i32
  }
  func.func @transform_13(%arg0: i32, %arg1: i32) -> (i32, i32, i32) {
    %c0_i32 = arith.constant 0 : i32
    %c0_i32_0 = arith.constant 0 : i32
    %c0_i32_1 = arith.constant 0 : i32
    return %arg1, %c0_i32, %c0_i32_0 : i32, i32, i32
  }
  func.func @transform_14(%arg0: i32, %arg1: i32) -> (i32, i32, i32) {
    %c0_i32 = arith.constant 0 : i32
    %c0_i32_0 = arith.constant 0 : i32
    %c0_i32_1 = arith.constant 0 : i32
    return %arg1, %c0_i32, %c0_i32_0 : i32, i32, i32
  }
  func.func @transform_15(%arg0: i32, %arg1: i32) -> (i32, i32) {
    %c0_i32 = arith.constant 0 : i32
    %c0_i32_0 = arith.constant 0 : i32
    %c0_i32_1 = arith.constant 0 : i32
    return %c0_i32, %c0_i32_0 : i32, i32
  }
  func.func @transform_16(%arg0: i32, %arg1: i32) -> (i32, i32) {
    %c0_i32 = arith.constant 0 : i32
    %c0_i32_0 = arith.constant 0 : i32
    %c0_i32_1 = arith.constant 0 : i32
    return %c0_i32, %c0_i32_0 : i32, i32
  }
  func.func @transform_17(%arg0: i32, %arg1: i32) -> (i32, i32) {
    %c0_i32 = arith.constant 0 : i32
    %c0_i32_0 = arith.constant 0 : i32
    %c0_i32_1 = arith.constant 0 : i32
    return %c0_i32, %c0_i32_0 : i32, i32
  }
  func.func @transform_18(%arg0: i32, %arg1: i32) -> (i32, i32) {
    %c0_i32 = arith.constant 0 : i32
    %c0_i32_0 = arith.constant 0 : i32
    %c0_i32_1 = arith.constant 0 : i32
    return %c0_i32, %c0_i32_0 : i32, i32
  }
  func.func @transform_19(%arg0: i32, %arg1: i32) -> (i32, i32, i32) {
    %c0_i32 = arith.constant 0 : i32
    %c0_i32_0 = arith.constant 0 : i32
    %c0_i32_1 = arith.constant 0 : i32
    return %arg0, %c0_i32, %c0_i32_0 : i32, i32, i32
  }
}

</mosaic_0001>

<bundles_post_ra>
// kernel: vit_forward.1
= control target key start
LH: loop header
LB: loop body
LE: loop exit
PB: predicated region body
PF: predicated region fallthrough
CT: control target
= control target key end

     0   :  { %s3964_s0 = inlined_call_operand.vmem [shape: bf16[16,768], index: 0, kind: input, shape index: {}]   ;;  %s3965_s1 = inlined_call_operand.vmem [shape: bf16[768,64], index: 1, kind: input, shape index: {}]   ;;  %s3966_s2 = inlined_call_operand.vmem [shape: f32[8,64], index: 2, kind: input, shape index: {}]   ;;  %s3967_s3 = inlined_call_operand.vmem [shape: f32[2,1,64], index: 3, kind: input, shape index: {}]   ;;  %s3968_s4 = inlined_call_operand.vmem [shape: f32[2,1,64], index: 4, kind: input, shape index: {}]   ;;  %s3969_s5 = inlined_call_operand.vmem [shape: bf16[2,64,192], index: 5, kind: input, shape index: {}]   ;;  %s3970_s6 = inlined_call_operand.vmem [shape: f32[2,1,192], index: 6, kind: input, shape index: {}]   ;;  %s3971_s7 = inlined_call_operand.vmem [shape: bf16[2,64,64], index: 7, kind: input, shape index: {}]   ;;  %s3972_s8 = inlined_call_operand.vmem [shape: f32[2,1,64], index: 8, kind: input, shape index: {}]   ;;  %s3973_s9 = inlined_call_operand.vmem [shape: f32[2,1,64], index: 9, kind: input, shape index: {}]   ;;  %s3974_s10 = inlined_call_operand.vmem [shape: f32[2,1,64], index: 10, kind: input, shape index: {}]   ;;  %s3975_s11 = inlined_call_operand.vmem [shape: bf16[2,64,256], index: 11, kind: input, shape index: {}]   ;;  %s3976_s12 = inlined_call_operand.vmem [shape: f32[2,1,256], index: 12, kind: input, shape index: {}]   ;;  %s3977_s13 = inlined_call_operand.vmem [shape: bf16[2,256,64], index: 13, kind: input, shape index: {}]   ;;  %s3978_s14 = inlined_call_operand.vmem [shape: f32[2,1,64], index: 14, kind: input, shape index: {}]   ;;  %s3979_s15 = inlined_call_operand.vmem [shape: f32[1,64], index: 15, kind: input, shape index: {}]   ;;  %s3980_s16 = inlined_call_operand.vmem [shape: f32[1,64], index: 16, kind: input, shape index: {}]   ;;  %s3981_s17 = inlined_call_operand.vmem [shape: bf16[64,128], index: 17, kind: input, shape index: {}]   ;;  %s3982_s18 = inlined_call_operand.vmem [shape: f32[1,128], index: 18, kind: input, shape index: {}]   ;;  %s3983_s19 = inlined_call_operand.hbm [shape: f32[2,1,128], index: 19, kind: output, shape index: {}]  }
   0x1   :  { %3998 = sst [smem:[#allocation18_spill]] %s3964_s0 }
   0x2   :  { %3999 = sst [smem:[#allocation19_spill]] %s3965_s1 }
   0x3   :  { %4000 = sst [smem:[#allocation20_spill]] %s3966_s2 }
   0x4   :  { %4001 = sst [smem:[#allocation21_spill]] %s3967_s3 }
   0x5   :  { %4002 = sst [smem:[#allocation22_spill]] %s3968_s4 }
   0x6   :  { %4003 = sst [smem:[#allocation23_spill]] %s3969_s5 }
   0x7   :  { %4004 = sst [smem:[#allocation24_spill]] %s3970_s6 }
   0x8   :  { %4005 = sst [smem:[#allocation25_spill]] %s3979_s15 }
   0x9   :  { %4006 = sst [smem:[#allocation26_spill]] %s3980_s16 }
   0xa   :  { %4007 = sst [smem:[#allocation27_spill]] %s3981_s17 }
   0xb   :  { %4008 = sst [smem:[#allocation28_spill]] %s3982_s18 }
   0xc   :  { %4009 = sst [smem:[#allocation29_spill]] %s3983_s19 }
   0xd   :  { %24 = vsyncpa [#allocation4], 0 }
   0xe   :  { %26 = vsyncpa [#allocation4 + $0x1], 0  ;;  %s3422_s0 = smov 0   ;;  %s3424_s30 = smov 0  }
   0xf   :  { %s3426_s20 = smov 0   ;;  %s3428_s21 = smov 0  }
  0x10   :  { %s3430_s1 = smov 0   ;;  %s3432_s22 = smov 0  }
  0x11   :  { %s3434_s2 = smov 0   ;;  %s3436_s23 = smov 0  }
  0x12 LB: > { %4010 = sst [smem:[#allocation6_spill]] %s3278_s0  ;;  %s2676_s24 = sadd.s32 4294967295, %s3306_s23   ;;  %s3306_s23 = sphi %s3436_s23, %s32_s23   ;;  %s3302_s2 = sphi %s3434_s2, %s4057_s2   ;;  %s3298_s22 = sphi %s3432_s22, %s4056_s22   ;;  %s3294_s1 = sphi %s3430_s1, %s4055_s1   ;;  %s3290_s21 = sphi %s3428_s21, %s4054_s21   ;;  %s3286_s20 = sphi %s3426_s20, %s4053_s20   ;;  %s3282_s30 = sphi %s3424_s30, %s4059_s30   ;;  %s3278_s0 = sphi %s3422_s0, %s4058_s0  }
  0x13   : > { %4011 = sst [smem:[#allocation7_spill]] %s3286_s20  ;;  %s2677_s25 = sadd.s32 4294967294, %s3306_s23  }
  0x14   : > { %4012 = sst [smem:[#allocation8_spill]] %s3294_s1  ;;  %s41_s3 = sadd.s32 1, %s3298_s22 }
  0x15   : > { %4013 = sst [smem:[#allocation9_spill]] %s3298_s22  ;;  %p42_p0 = scmp.ge.s32.totalorder %s41_s3, 2 }
  0x16   : > { %4014 = sst [smem:[#allocation10_spill]] %s3302_s2  ;;  %s44_s26 = sadd.s32 1, %s3302_s2 }
  0x17   : > { %4015 = sst [smem:[#allocation11_spill]] %s3306_s23  ;;  %p525_p1 = scmp.ne.s32.totalorder %s3286_s20, %s3282_s30 }
  0x18   : > { %p526_p2 = scmp.eq.s32.totalorder %s2676_s24, 3  ;;  %s4061_s3 = smov (%p42_p0, %s41_s3), 0 }
  0x19   : > { %4016 = sst [smem:[#allocation12_spill]] %s4061_s3  ;;  %s4063_s26 = smov (!%p42_p0, %s44_s26), %s3302_s2 }
  0x1a   : > { %p3471_p3 = por %p526_p2, %p525_p1  ;;  %p531_p4 = scmp.ne.s32.totalorder %s3282_s30, %s3278_s0 }
  0x1b   : > { %p46_p5 = scmp.ge.s32.totalorder %s4063_s26, 2  ;;  %p532_p6 = scmp.eq.s32.totalorder %s2677_s25, 3 }
  0x1c   : > { %s4017_s27 = scalar_select %p3471_p3, 1, 0 }
  0x1d   : > { %p2680_p7 = scmp.ge.s32.totalorder %s3306_s23, 1  ;;  %p658_p8 = scmp.lt.s32.totalorder %s3306_s23, 5 }
  0x1e   : > { %4018 = sst [smem:[#allocation13_spill]] %s4017_s27  ;;  %s4065_s26 = smov (%p46_p5, %s4063_s26), 0 }
  0x1f   : > { %4019 = sst [smem:[#allocation14_spill]] %s4065_s26  ;;  %p3481_p9 = por %p532_p6, %p531_p4 }
  0x20   : > { %p659_p10 = pnand %p2680_p7, %p658_p8  ;;  %s512_s29 = ssub.s32 %s3302_s2, %s4065_s26 }
  0x21   : > { %s4020_s28 = scalar_select %p3481_p9, 1, 0 }
  0x22   : > { %s515_s24 = sadd.s32 1, %s3286_s20  ;;  %p513_p11 = scmp.eq.s32.totalorder %s512_s29, 0 }
  0x23   : > { %4021 = sst [smem:[#allocation15_spill]] %s4020_s28  ;;  %662 = sbr.rel (%p659_p10) target bundleno = 3533 (0xdcd), region = 96 }
  0x24   : > { %s3489_s3 = scalar_select %p513_p11, %s3286_s20, %s515_s24  }
  0x26   : > { %4022 = sst [smem:[#allocation16_spill]] %s3489_s3 }
  0x2a   : > { %p759_p12 = scmp.lt.s32.totalorder %s3294_s1, 1  ;;  %p764_p13 = scmp.lt.s32.totalorder %s3290_s21, 1 }
  0x2b   : > { %s4025_s27 = sld [smem:[#allocation18_spill]]  ;;  %s4026_s5 = sld [smem:[#allocation23_spill]] }
  0x2c   : > { %s760_s22 = scalar_select %p759_p12, %s3294_s1, 1 }
  0x2d   : > { %s3496_s0 = scalar_select %p764_p13, %s3290_s21, 1 }
  0x2e   : > { %s2999_s29 = smul.u32 24, %s760_s22  ;;  %s4027_s6 = sld [smem:[#allocation24_spill]] }
  0x2f   : > { %s2809_s18 = sshll.u32 %s3496_s0, 6  ;;  %s2684_s17 = sshll.u32 %s3496_s0, 1 }
  0x30   : > { %s2810_s20 = sshll.u32 %s3496_s0, 5  ;;  %s3549_s3 = scalar_lea.vmem %s3976_s12, %s2684_s17 }
  0x31   : > { %s3509_s1 = scalar_lea.vmem %s4025_s27, %s2999_s29  ;;  %s3515_s22 = scalar_lea.vmem %s4026_s5, %s2809_s18 }
  0x32   : > { %s3527_s19 = scalar_lea.vmem %s3971_s7, %s2810_s20  ;;  %s2812_s23 = sshll.u32 %s3496_s0, 7 }
  0x33   : > { %s809_s25 = scalar_lea.vmem %s3978_s14, %s3496_s0  ;;  %s3559_s4 = scalar_lea.vmem %s3977_s13, %s2812_s23 }
  0x34   : > { %s3521_s2 = scalar_lea.vmem %s4027_s6, %s2684_s17  ;;  %s4029_s5 = sand.u32 1, %s3282_s30  }
  0x35   : > { %4028 = sst [smem:[#allocation17_spill]] %s3521_s2  ;;  %s3544_s2 = scalar_lea.vmem %s3975_s11, %s2809_s18 }
  0x36   : > { %s3563_s26 = scalar_lea.vmem [#allocation3], %s4029_s5  ;;  %p2692_p0 = scmp.ne.s32.totalorder %s3290_s21, 0 }
  0x37   : > { %s4030_s17 = sld [smem:[#allocation19_spill]] (!%p2692_p0)  ;;  %v815_v32 = vld [vmem:[%s3509_s1] sm:$0xff] (!%p2692_p0)  ;;  %v816_v33 = vld [vmem:[%s3509_s1 + $0x8] sm:$0xff] (!%p2692_p0)  ;;  %v817_v47 = vld [vmem:[%s3509_s1 + $0x10] sm:$0xff] (!%p2692_p0)  ;;  %s4031_s15 = sld [smem:[#allocation20_spill]] (!%p2692_p0)  ;;  %vm1345_vm0 = vcmask (!%p2692_p0), 523264  }
  0x38   : > { %814 = sbr.rel (%p2692_p0) target bundleno = 347 (0x15b), region = 100  ;;  %v2693_v34 = vcombine.low (!%p2692_p0), %v815_v32, %v815_v32  ;;  %v2694_v35 = vcombine.high (!%p2692_p0), %v815_v32, %v815_v32  ;;  %v2695_v36 = vcombine.low (!%p2692_p0), %v816_v33, %v816_v33  ;;  %v2696_v37 = vcombine.high (!%p2692_p0), %v816_v33, %v816_v33 }
  0x39   : > { %v2698_v48 = vcombine.high (!%p2692_p0), %v817_v47, %v817_v47  ;;  %v2697_v56 = vcombine.low (!%p2692_p0), %v817_v47, %v817_v47 }
  0x3a   : > { %1255 = vmatprep.mubr.bf16.mxu0 (!%p2692_p0), %v2694_v35  ;;  %1295 = vmatprep.mubr.bf16.mxu1 (!%p2692_p0), %v2696_v37 }
  0x3d   : > { %v3084_v0 = vld [vmem:[%s4030_s17 + $0x40] sm:$0xff] (!%p2692_p0)   ;;  %v3088_v4 = vld [vmem:[%s4030_s17 + $0x48] sm:$0xff] (!%p2692_p0)   ;;  %v3092_v8 = vld [vmem:[%s4030_s17 + $0x50] sm:$0xff] (!%p2692_p0)  }
  0x3e   : > { %v3085_v1 = vld [vmem:[%s4030_s17 + $0xc0] sm:$0xff] (!%p2692_p0)   ;;  %2813 = vmatprep.subr.bf16.mxu0 (!%p2692_p0), %v3084_v0  ;;  %v3089_v5 = vld [vmem:[%s4030_s17 + $0xc8] sm:$0xff] (!%p2692_p0)   ;;  %v3093_v9 = vld [vmem:[%s4030_s17 + $0xd0] sm:$0xff] (!%p2692_p0)  }
  0x3f   : > { %v3086_v2 = vld [vmem:[%s4030_s17] sm:$0xff]   ;;  %2835 = vmatprep.subr.bf16.mxu1 %v3085_v1  ;;  %v3090_v6 = vld [vmem:[%s4030_s17 + $0x8] sm:$0xff]   ;;  %v3094_v10 = vld [vmem:[%s4030_s17 + $0x10] sm:$0xff]  }
  0x40   : > { %v3087_v3 = vld [vmem:[%s4030_s17 + $0x80] sm:$0xff]   ;;  %2814 = vmatpush3.bf16.msra.mxu0 %v3086_v2  ;;  %v3091_v7 = vld [vmem:[%s4030_s17 + $0x88] sm:$0xff]   ;;  %v3095_v11 = vld [vmem:[%s4030_s17 + $0x90] sm:$0xff]  }
  0x41   : > { %2836 = vmatpush3.bf16.msra.mxu1 %v3087_v3  ;;  %2815 = vmatprep.subr.bf16.mxu0 %v3088_v4  ;;  %v3096_v12 = vld [vmem:[%s4030_s17 + $0x58] sm:$0xff]   ;;  %v3100_v16 = vld [vmem:[%s4030_s17 + $0x60] sm:$0xff]   ;;  %v3104_v20 = vld [vmem:[%s4030_s17 + $0x68] sm:$0xff]  }
  0x42   : > { %2837 = vmatprep.subr.bf16.mxu1 %v3089_v5  ;;  %v3097_v13 = vld [vmem:[%s4030_s17 + $0xd8] sm:$0xff]   ;;  %v3101_v17 = vld [vmem:[%s4030_s17 + $0xe0] sm:$0xff]   ;;  %v3105_v21 = vld [vmem:[%s4030_s17 + $0xe8] sm:$0xff]  }
  0x43   : > { %v3098_v14 = vld [vmem:[%s4030_s17 + $0x18] sm:$0xff]   ;;  %v3102_v18 = vld [vmem:[%s4030_s17 + $0x20] sm:$0xff]   ;;  %v3106_v22 = vld [vmem:[%s4030_s17 + $0x28] sm:$0xff]  }
  0x44   : > { %2816 = vmatpush3.bf16.msra.mxu0 %v3090_v6  ;;  %v3099_v15 = vld [vmem:[%s4030_s17 + $0x98] sm:$0xff]   ;;  %v3103_v19 = vld [vmem:[%s4030_s17 + $0xa0] sm:$0xff]   ;;  %v3107_v23 = vld [vmem:[%s4030_s17 + $0xa8] sm:$0xff]  }
  0x45   : > { %2838 = vmatpush3.bf16.msra.mxu1 %v3091_v7  ;;  %2817 = vmatprep.subr.bf16.mxu0 %v3092_v8  ;;  %v3108_v24 = vld [vmem:[%s4030_s17 + $0x70] sm:$0xff]   ;;  %v3112_v28 = vld [vmem:[%s4030_s17 + $0x78] sm:$0xff]   ;;  %v3120_v38 = vld [vmem:[%s4030_s17 + $0x140] sm:$0xff]  }
  0x46   : > { %2839 = vmatprep.subr.bf16.mxu1 %v3093_v9  ;;  %v3109_v25 = vld [vmem:[%s4030_s17 + $0xf0] sm:$0xff]   ;;  %v3113_v29 = vld [vmem:[%s4030_s17 + $0xf8] sm:$0xff]   ;;  %v3121_v39 = vld [vmem:[%s4030_s17 + $0x100] sm:$0xff]  }
  0x47   : > { %v3110_v26 = vld [vmem:[%s4030_s17 + $0x30] sm:$0xff]   ;;  %v3114_v30 = vld [vmem:[%s4030_s17 + $0x38] sm:$0xff]   ;;  %v3122_v40 = vld [vmem:[%s4030_s17 + $0x148] sm:$0xff]  }
  0x48   : > { %2818 = vmatpush3.bf16.msra.mxu0 %v3094_v10  ;;  %v3111_v27 = vld [vmem:[%s4030_s17 + $0xb0] sm:$0xff]   ;;  %v3115_v31 = vld [vmem:[%s4030_s17 + $0xb8] sm:$0xff]   ;;  %v3123_v41 = vld [vmem:[%s4030_s17 + $0x108] sm:$0xff]  }
  0x49   : > { %2840 = vmatpush3.bf16.msra.mxu1 %v3095_v11  ;;  %2819 = vmatprep.subr.bf16.mxu0 %v3096_v12  ;;  %v3124_v42 = vld [vmem:[%s4030_s17 + $0x150] sm:$0xff]   ;;  %v3126_v44 = vld [vmem:[%s4030_s17 + $0x158] sm:$0xff]   ;;  %v3128_v46 = vld [vmem:[%s4030_s17 + $0x160] sm:$0xff]  }
  0x4a   : > { %2841 = vmatprep.subr.bf16.mxu1 %v3097_v13  ;;  %v3125_v43 = vld [vmem:[%s4030_s17 + $0x110] sm:$0xff]   ;;  %v3127_v45 = vld [vmem:[%s4030_s17 + $0x118] sm:$0xff]   ;;  %v3129_v49 = vld [vmem:[%s4030_s17 + $0x120] sm:$0xff]  }
  0x4b   : > { %v3130_v50 = vld [vmem:[%s4030_s17 + $0x168] sm:$0xff]   ;;  %v3132_v52 = vld [vmem:[%s4030_s17 + $0x170] sm:$0xff]   ;;  %v3134_v54 = vld [vmem:[%s4030_s17 + $0x178] sm:$0xff]  }
  0x4c   : > { %2820 = vmatpush3.bf16.msra.mxu0 %v3098_v14  ;;  %v3131_v51 = vld [vmem:[%s4030_s17 + $0x128] sm:$0xff]   ;;  %v3133_v53 = vld [vmem:[%s4030_s17 + $0x130] sm:$0xff]   ;;  %v3135_v55 = vld [vmem:[%s4030_s17 + $0x138] sm:$0xff]  }
  0x4d   : > { %2842 = vmatpush3.bf16.msra.mxu1 %v3099_v15  ;;  %2821 = vmatprep.subr.bf16.mxu0 %v3100_v16  ;;  %v1343_v8 = vld [vmem:[%s4031_s15] sm:$0xff] }
  0x4e   : > { %2843 = vmatprep.subr.bf16.mxu1 %v3101_v17 }
  0x50   : > { %2822 = vmatpush3.bf16.msra.mxu0 %v3102_v18 }
  0x51   : > { %2844 = vmatpush3.bf16.msra.mxu1 %v3103_v19  ;;  %2823 = vmatprep.subr.bf16.mxu0 %v3104_v20 }
  0x52   : > { %2845 = vmatprep.subr.bf16.mxu1 %v3105_v21 }
  0x54   : > { %2824 = vmatpush3.bf16.msra.mxu0 %v3106_v22 }
  0x55   : > { %2846 = vmatpush3.bf16.msra.mxu1 %v3107_v23  ;;  %2825 = vmatprep.subr.bf16.mxu0 %v3108_v24 }
  0x56   : > { %2847 = vmatprep.subr.bf16.mxu1 %v3109_v25 }
  0x58   : > { %2826 = vmatpush3.bf16.msra.mxu0 %v3110_v26 }
  0x59   : > { %2848 = vmatpush3.bf16.msra.mxu1 %v3111_v27  ;;  %2827 = vmatprep.subr.bf16.mxu0 %v3112_v28 }
  0x5a   : > { %2849 = vmatprep.subr.bf16.mxu1 %v3113_v29 }
  0x5c   : > { %2828 = vmatpush3.bf16.msra.mxu0 %v3114_v30 }
  0x5d   : > { %2850 = vmatpush3.bf16.msra.mxu1 %v3115_v31  ;;  %2857 = vmatprep.subr.bf16.mxu0 %v3120_v38 }
  0x5f   : > { %1256 = vmatmul.mubr.bf16.vlgmr.msra.gmra.mrb[0].mxu0 %v2693_v34 }
  0x60   : > { %1296 = vmatmul.mubr.bf16.vlgmr.msra.gmra.mrb[0].mxu1 %v2695_v36  ;;  %2858 = vmatpush3.bf16.msra.mxu0 %v3121_v39 }
  0x61   : > { %2859 = vmatprep.subr.bf16.mxu0 %v3122_v40  ;;  %1335 = vmatprep.mubr.bf16.mxu0 %v2698_v48 }
  0x64   : > { %2860 = vmatpush3.bf16.msra.mxu0 %v3123_v41 }
  0x65   : > { %2861 = vmatprep.subr.bf16.mxu0 %v3124_v42 }
  0x68   : > { %2862 = vmatpush3.bf16.msra.mxu0 %v3125_v43 }
  0x69   : > { %2863 = vmatprep.subr.bf16.mxu0 %v3126_v44 }
  0x6c   : > { %2864 = vmatpush3.bf16.msra.mxu0 %v3127_v45 }
  0x6d   : > { %2865 = vmatprep.subr.bf16.mxu0 %v3128_v46 }
  0x70   : > { %2866 = vmatpush3.bf16.msra.mxu0 %v3129_v49 }
  0x71   : > { %2867 = vmatprep.subr.bf16.mxu0 %v3130_v50 }
  0x74   : > { %2868 = vmatpush3.bf16.msra.mxu0 %v3131_v51 }
  0x75   : > { %2869 = vmatprep.subr.bf16.mxu0 %v3132_v52 }
  0x78   : > { %2870 = vmatpush3.bf16.msra.mxu0 %v3133_v53 }
  0x79   : > { %2871 = vmatprep.subr.bf16.mxu0 %v3134_v54 }
  0x7c   : > { %2872 = vmatpush3.bf16.msra.mxu0 %v3135_v55 }
  0x7f   : > { %1336 = vmatmul.mubr.bf16.vlgmr.msra.gmra.mrb[4].mxu0 %v2697_v56 }
 0x132   : > { %v2829_v57 = vpop.f32.mrb[0].mxu0 }
 0x133   : > { %v2851_v58 = vpop.f32.mrb[0].mxu1  ;;  %v2830_v59 = vpop.f32.mrb[1].mxu0 }
 0x134   : > { %v2852_v60 = vpop.f32.mrb[1].mxu1  ;;  %v2831_v61 = vadd.f32 %v2830_v59, %v2829_v57  ;;  %v2832_v63 = vpop.f32.mrb[2].mxu0 }
 0x135   : > { %v2853_v62 = vadd.f32 %v2852_v60, %v2851_v58  ;;  %v2854_v0 = vpop.f32.mrb[2].mxu1  ;;  %v2833_v1 = vpop.f32.mrb[3].mxu0 }
 0x136   : > { %v2855_v2 = vpop.f32.mrb[3].mxu1 }
 0x137   : > { %v1298_v3 = vadd.f32 %v2853_v62, %v2831_v61 }
 0x152   : > { %v2873_v4 = vpop.f32.mrb[4].mxu0 }
 0x153   : > { %v2874_v5 = vpop.f32.mrb[5].mxu0 }
 0x154   : > { %v2875_v6 = vadd.f32 %v2874_v5, %v2873_v4  ;;  %v2876_v7 = vpop.f32.mrb[6].mxu0 }
 0x155   : > { %v2877_v9 = vpop.f32.mrb[7].mxu0 }
 0x156   : > { %v1338_v10 = vadd.f32 %v2875_v6, %v1298_v3 }
 0x158   : > { %v1344_v11 = vadd.f32 %v1343_v8, %v1338_v10 }
 0x15a   : > { %1346 = vst.msk [vmem:[#allocation2] sm:$0xff] %vm1345_vm0, %v1344_v11 }
 0x15b PF: > { %vm1354_vm1 = vcmask 523264   ;;  %v3138_v19 = vld [vmem:[%s3515_s22 + $0x4] ss:$8 sps:$4 sm:$0xff]   ;;  %v3140_v20 = vld [vmem:[%s3515_s22] ss:$8 sps:$4 sm:$0xff]   ;;  %v3308_v23 = vmov 0   ;;  %v1348_v38 = vlaneseq  ;;  %s4038_s29 = scalar_lea.vmem %s3973_s9, %s3496_s0 }
 0x15c   : > { %v3141_v21 = vld [vmem:[%s3515_s22 + $0x14] ss:$8 sps:$4 sm:$0xff]   ;;  %1447 = vmatprep.subr.bf16.mxu1 %v3138_v19  ;;  %v3143_v22 = vld [vmem:[%s3515_s22 + $0x10] ss:$8 sps:$4 sm:$0xff]   ;;  %1479 = vmatprep.mubr.bf16.mxu1 %v3308_v23  ;;  %v3144_v24 = vld [vmem:[%s3515_s22 + $0x24] ss:$8 sps:$4 sm:$0xff]  }
 0x15d   : > { %1448 = vmatpush1.bf16.msra.mxu1 %v3140_v20  ;;  %v3146_v25 = vld [vmem:[%s3515_s22 + $0x20] ss:$8 sps:$4 sm:$0xff]   ;;  %v3147_v26 = vld [vmem:[%s3515_s22 + $0x34] ss:$8 sps:$4 sm:$0xff]   ;;  %v3149_v27 = vld [vmem:[%s3515_s22 + $0x30] ss:$8 sps:$4 sm:$0xff]  }
 0x15e   : > { %1449 = vmatprep.subr.bf16.mxu1 %v3141_v21  ;;  %s4032_s5 = sld [smem:[#allocation17_spill]]  ;;  %s4033_s18 = sld [smem:[#allocation21_spill]]  ;;  %v3743_v39 = vshrl.u32 %v1348_v38, 7  ;;  %v3309_v43 = vmov 0.0   ;;  %vm3310_vm2 = vmmov 0   ;;  %vm1519_vm3 = vcmask 130048  }
 0x15f   : > { %s4035_s20 = sld [smem:[#allocation22_spill]]  ;;  %2939 = vmatprep.subr.bf16.mxu0 %v3309_v43  ;;  %2941 = vmatprep.mubr.msk.bf16.mxu0 %vm3310_vm2, %v3309_v43  ;;  %s3311_s22 = smov 80   ;;  %vm1765_vm4 = vcmask 1043456   ;;  %v1349_v5 = vand.u32 127, %v1348_v38  ;;  %v3315_v6 = vmov -1e+30  }
 0x160   : > { %v1396_v40 = vsub.s32 0, %v3743_v39  ;;  %s3312_s23 = smov 112   ;;  %s3313_s27 = smov 96   ;;  %v1400_v58 = vsub.s32 1, %v3743_v39  ;;  %vm1713_vm6 = vcmask 64512   ;;  %vm1960_vm7 = vcmask 261120  }
 0x161   : > { %v3716_v12 = vld [vmem:[#allocation2] sm:$0xff]  ;;  %1450 = vmatpush1.bf16.msra.mxu1 %v3143_v22  ;;  %s3314_s15 = smov 64   ;;  %vm1350_vm5 = vcmp.lt.s32.totalorder %v1349_v5, 5  ;;  %s3317_s6 = smov 32   ;;  %vm1962_vm8 = vcmask 392192  }
 0x162   : > { %v1355_v13 = vsel %vm1354_vm1, %v3716_v12, 0.0  ;;  %1451 = vmatprep.subr.bf16.mxu1 %v3144_v24  ;;  %v1351_v7 = vsel %vm1350_vm5, 0.0, %v3315_v6  ;;  %s3318_s1 = smov 48   ;;  %p2800_p1 = scmp.ne.s32.totalorder %s3290_s21, 1 }
 0x163   : > { %1356 = vadd.xlane.f32.xlu0 %v1355_v13  ;;  %vm2377_vm9 = vcmask (!%p2800_p1), 516096   ;;  %vm3320_vm10 = vmmov (!%p2800_p1), 0  }
 0x164   : > { %s4034_s24 = scalar_lea.vmem %s4033_s18, %s3496_s0  ;;  %v1392_v41 = vld [vmem:[%s4032_s5] sm:$0x3]  ;;  %s3316_s5 = smov 16  }
 0x165   : > { %1452 = vmatpush1.bf16.msra.mxu1 %v3146_v25  ;;  %v2747_v32 = vld [vmem:[%s4034_s24] ss:$0 sm:$0xff]  ;;  %s4036_s16 = scalar_lea.vmem %s4035_s20, %s3496_s0  ;;  %v1397_v42 = vrot.slane %v1392_v41, %v1396_v40  ;;  %v1401_v60 = vrot.slane %v1392_v41, %v1400_v58  ;;  %s4037_s24 = scalar_lea.vmem %s3972_s8, %s3496_s0 }
 0x166   : > { %1453 = vmatprep.subr.bf16.mxu1 %v3147_v26  ;;  %v2748_v34 = vld [vmem:[%s4036_s16] ss:$0 sm:$0xff]  ;;  %s4043_s20 = sld [smem:[#allocation26_spill]] (!%p2800_p1) }
 0x169   : > { %1454 = vmatpush1.bf16.msra.mxu1 %v3149_v27 }
 0x16a   : > { %2927 = vmatprep.subr.bf16.mxu1 %v3309_v43 }
 0x1f0   : > { %v1357_v14 = vpop.xlane.xlu0 %1356 }
 0x1f1   : > { %v1359_v15 = vmul.f32 0.015625, %v1357_v14 }
 0x1f3   : > { %v1360_v16 = vsub.f32 %v3716_v12, %v1359_v15 }
 0x1f5   : > { %v1361_v17 = vmul.f32 %v1360_v16, %v1360_v16 }
 0x1f7   : > { %v1362_v18 = vsel %vm1354_vm1, %v1361_v17, 0.0 }
 0x1f8   : > { %1363 = vadd.xlane.f32.xlu0 %v1362_v18 }
 0x285   : > { %v1364_v28 = vpop.xlane.xlu0 %1363 }
 0x286   : > { %v1365_v29 = vmul.f32 0.015625, %v1364_v28 }
 0x288   : > { %v1366_v30 = vadd.f32 1e-06, %v1365_v29 }
 0x28a   : > { %3182 = vrsqrt.f32 %v1366_v30 }
 0x294   : > { %v3183_v31 = vpop.eup %3182 }
 0x295   : > { %v1368_v33 = vmul.f32 %v3183_v31, %v1360_v16 }
 0x297   : > { %v1375_v35 = vmul.f32 %v2747_v32, %v1368_v33 }
 0x299   : > { %v1382_v36 = vadd.f32 %v2748_v34, %v1375_v35 }
 0x29b   : > { %v1383_v37 = vpack.c.bf16 %v1382_v36, %v1382_v36 }
 0x29d   : > { %2757 = vmatmul.mubr.msk.bf16.vlgmr.msra.gmra.mrb[0].mxu1 %vm1354_vm1, %v1383_v37 }
 0x29e   : > { %2929 = vmatprep.mubr.msk.bf16.mxu1 %vm3310_vm2, %v3309_v43 }
 0x370   : > { %v1481_v44 = vpop.f32.mrb[0].mxu1 }
 0x371   : > { %v1482_v45 = vadd.f32 %v1481_v44, %v1397_v42  ;;  %v1483_v46 = vpop.f32.mrb[1].mxu1 }
 0x372   : > { %v1485_v47 = vpop.f32.mrb[2].mxu1  ;;  %v3768_v63 = vadd.f32 %v1483_v46, %v1401_v60 }
 0x373   : > { %v1486_v48 = vpop.f32.mrb[3].mxu1  ;;  %1495 = vrot.lane.b32.xlu0 %v1482_v45, %s3311_s22  ;;  %1489 = vrot.lane.b32.xlu1 %v1482_v45, %s3312_s23  ;;  %v1498_v49 = vpack.c.bf16 %v1482_v45, %v1482_v45 }
 0x374   : > { %v1512_v3 = vpack.c.bf16 %v3768_v63, %v3768_v63 }
 0x376   : > { %v1767_v4 = vsel %vm1765_vm4, %v1512_v3, 0 }
 0x377   : > { %1492 = vrot.lane.b32.xlu1 %v1482_v45, %s3313_s27 }
 0x37b   : > { %1517 = vrot.lane.b32.xlu1 %v1498_v49, %s3314_s15 }
 0x3e5   : > { %v1490_v50 = vpop.permute.xlu1 %1489  ;;  %v1496_v54 = vpop.permute.xlu0 %1495 }
 0x3e6   : > { %v1499_v51 = vpack.c.bf16 %v1490_v50, %v1490_v50  ;;  %v1501_v56 = vpack.c.bf16 %v1496_v54, %v1496_v54 }
 0x3e8   : > { %1567 = vrot.lane.b32.xlu1 %v1499_v51, %s3314_s15 }
 0x3e9   : > { %v1493_v52 = vpop.permute.xlu1 %1492 }
 0x3ea   : > { %v1500_v53 = vpack.c.bf16 %v1493_v52, %v1493_v52 }
 0x3ec   : > { %1616 = vrot.lane.b32.xlu1 %v1500_v53, %s3314_s15 }
 0x3ed   : > { %v1518_v55 = vpop.permute.xlu1 %1517 }
 0x3ee   : > { %v1524_v57 = vsel %vm1519_vm3, %v1518_v55, 0 }
 0x3ef   : > { %2928 = vmatpush3.bf16.xpose.msra.mxu1 %v1524_v57 }
 0x3f0   : > { %1665 = vrot.lane.b32.xlu1 %v1501_v56, %s3314_s15  ;;  %2933 = vmatprep.subr.bf16.mxu1 %v3309_v43 }
 0x3f6   : > { %2930 = vmatmul.mubr.msk.bf16.vlgmr.msra.gmra.mrb[4].mxu1 %vm1519_vm3, %v1498_v49 }
 0x3f7   : > { %2935 = vmatprep.mubr.msk.bf16.mxu1 %vm3310_vm2, %v3309_v43 }
 0x45a   : > { %v1568_v59 = vpop.permute.xlu1 %1567 }
 0x45b   : > { %v1573_v61 = vsel %vm1519_vm3, %v1568_v59, 0 }
 0x45c   : > { %2934 = vmatpush3.bf16.xpose.msra.mxu1 %v1573_v61 }
 0x45d   : > { %2945 = vmatprep.subr.bf16.mxu1 %v3309_v43 }
 0x45e   : > { %v1617_v62 = vpop.permute.xlu1 %1616 }
 0x45f   : > { %v1622_v0 = vsel %vm1519_vm3, %v1617_v62, 0 }
 0x460   : > { %2940 = vmatpush3.bf16.xpose.msra.mxu0 %v1622_v0 }
 0x461   : > { %2951 = vmatprep.subr.bf16.mxu0 %v3309_v43 }
 0x462   : > { %v1666_v1 = vpop.permute.xlu1 %1665 }
 0x463   : > { %v1671_v2 = vsel %vm1519_vm3, %v1666_v1, 0  ;;  %2936 = vmatmul.mubr.msk.bf16.vlgmr.msra.gmra.mrb[8].mxu1 %vm1519_vm3, %v1499_v51 }
 0x464   : > { %2946 = vmatpush3.bf16.xpose.msra.mxu1 %v1671_v2  ;;  %2947 = vmatprep.mubr.msk.bf16.mxu1 %vm3310_vm2, %v3309_v43 }
 0x465   : > { %2957 = vmatprep.subr.bf16.mxu1 %v3309_v43 }
 0x467   : > { %2942 = vmatmul.mubr.msk.bf16.vlgmr.msra.gmra.mrb[0].mxu0 %vm1519_vm3, %v1500_v53 }
 0x468   : > { %2952 = vmatpush3.bf16.msra.mxu0 %v1767_v4  ;;  %2953 = vmatprep.mubr.msk.bf16.mxu0 %vm3310_vm2, %v3309_v43 }
 0x469   : > { %2963 = vmatprep.subr.bf16.mxu0 %v3309_v43 }
 0x46b   : > { %2948 = vmatmul.mubr.msk.bf16.vlgmr.msra.gmra.mrb[12].mxu1 %vm1519_vm3, %v1501_v56 }
 0x46c   : > { %2959 = vmatprep.mubr.msk.bf16.mxu1 %vm3310_vm2, %v3309_v43 }
 0x4c9   : > { %v1560_v8 = vpop.f32.mrb[4].mxu1 }
 0x4ca   : > { %v1561_v9 = vadd.f32 %v1560_v8, %v1351_v7  ;;  %v2931_v10 = vpop.f32.mrb[5].mxu1 }
 0x4cb   : > { %v1563_v11 = vpop.f32.mrb[6].mxu1 }
 0x4cc   : > { %v2932_v13 = vpop.f32.mrb[7].mxu1  ;;  %v1714_v14 = vsel %vm1713_vm6, %v1561_v9, -inf }
 0x4cd   : > { %1715 = vmax.xlane.f32.xlu1 %v1714_v14 }
 0x536   : > { %v1609_v15 = vpop.f32.mrb[8].mxu1 }
 0x537   : > { %v1610_v16 = vadd.f32 %v1609_v15, %v1351_v7  ;;  %v2937_v17 = vpop.f32.mrb[9].mxu1 }
 0x538   : > { %v1612_v18 = vpop.f32.mrb[10].mxu1 }
 0x539   : > { %v2938_v19 = vpop.f32.mrb[11].mxu1  ;;  %v1717_v20 = vsel %vm1713_vm6, %v1610_v16, -inf }
 0x53a   : > { %1718 = vmax.xlane.f32.xlu0 %v1717_v20  ;;  %v1658_v21 = vpop.f32.mrb[0].mxu0  ;;  %v3150_v20 = vld [vmem:[%s3527_s19] sm:$0xff]  }
 0x53b   : > { %v1659_v22 = vadd.f32 %v1658_v21, %v1351_v7  ;;  %v2943_v24 = vpop.f32.mrb[1].mxu0 }
 0x53c   : > { %v1661_v25 = vpop.f32.mrb[2].mxu0 }
 0x53d   : > { %v2944_v26 = vpop.f32.mrb[3].mxu0  ;;  %v1720_v27 = vsel %vm1713_vm6, %v1659_v22, -inf }
 0x53e   : > { %1721 = vmax.xlane.f32.xlu1 %v1720_v27  ;;  %v1707_v28 = vpop.f32.mrb[12].mxu1  ;;  %v3151_v26 = vld [vmem:[%s3527_s19 + $0x8] sm:$0xff]   ;;  %v3152_v27 = vld [vmem:[%s3527_s19 + $0x10] sm:$0xff]  }
 0x53f   : > { %v1708_v29 = vadd.f32 %v1707_v28, %v1351_v7  ;;  %v2949_v30 = vpop.f32.mrb[13].mxu1  ;;  %v3153_v28 = vld [vmem:[%s3527_s19 + $0x18] sm:$0xff]  }
 0x540   : > { %v1710_v31 = vpop.f32.mrb[14].mxu1 }
 0x541   : > { %v2950_v32 = vpop.f32.mrb[15].mxu1  ;;  %v1723_v33 = vsel %vm1713_vm6, %v1708_v29, -inf }
 0x542   : > { %1724 = vmax.xlane.f32.xlu0 %v1723_v33 }
 0x54f   : > { %1503 = vrot.lane.b32.xlu1 %v3768_v63, %s3312_s23  ;;  %s4040_s23 = sld [smem:[#allocation27_spill]] (!%p2800_p1) }
 0x55a   : > { %v1716_v34 = vpop.xlane.xlu1 %1715 }
 0x55b   : > { %v1726_v35 = vsub.f32 %v1561_v9, %v1716_v34 }
 0x55d   : > { %v1730_v36 = vmul.f32 1.442695, %v1726_v35 }
 0x55f   : > { %3184 = vpow2.f32 %v1730_v36 }
 0x569   : > { %v3185_v37 = vpop.eup %3184 }
 0x56a   : > { %v1738_v38 = vsel %vm1713_vm6, %v3185_v37, 0.0 }
 0x573   : > { %1739 = vadd.xlane.f32.xlu1 %v1738_v38 }
 0x5c7   : > { %v1719_v41 = vpop.xlane.xlu0 %1718 }
 0x5c8   : > { %v1727_v42 = vsub.f32 %v1610_v16, %v1719_v41 }
 0x5ca   : > { %v1732_v44 = vmul.f32 1.442695, %v1727_v42 }
 0x5cb   : > { %v1722_v45 = vpop.xlane.xlu1 %1721 }
 0x5cc   : > { %3186 = vpow2.f32 %v1732_v44  ;;  %v1728_v46 = vsub.f32 %v1659_v22, %v1722_v45 }
 0x5ce   : > { %v1734_v47 = vmul.f32 1.442695, %v1728_v46 }
 0x5cf   : > { %v1725_v48 = vpop.xlane.xlu0 %1724  ;;  %v1504_v49 = vpop.permute.xlu1 %1503 }
 0x5d0   : > { %3188 = vpow2.f32 %v1734_v47  ;;  %v1729_v50 = vsub.f32 %v1708_v29, %v1725_v48  ;;  %v1513_v51 = vpack.c.bf16 %v1504_v49, %v1504_v49  ;;  %v2766_v49 = vld [vmem:[%s4037_s24] ss:$0 sm:$0xff] }
 0x5d2   : > { %v1736_v52 = vmul.f32 1.442695, %v1729_v50  ;;  %v1813_v53 = vsel %vm1765_vm4, %v1513_v51, 0 }
 0x5d3   : > { %2958 = vmatpush3.bf16.msra.mxu1 %v1813_v53 }
 0x5d4   : > { %3190 = vpow2.f32 %v1736_v52  ;;  %2969 = vmatprep.subr.bf16.mxu1 %v3309_v43 }
 0x5d6   : > { %v3187_v54 = vpop.eup %3186 }
 0x5d7   : > { %v1741_v55 = vsel %vm1713_vm6, %v3187_v54, 0.0 }
 0x5d8   : > { %1742 = vadd.xlane.f32.xlu0 %v1741_v55 }
 0x5da   : > { %v3189_v56 = vpop.eup %3188 }
 0x5db   : > { %v1744_v57 = vsel %vm1713_vm6, %v3189_v56, 0.0 }
 0x5dc   : > { %1745 = vadd.xlane.f32.xlu1 %v1744_v57 }
 0x5de   : > { %v3191_v59 = vpop.eup %3190 }
 0x5df   : > { %v1747_v60 = vsel %vm1713_vm6, %v3191_v59, 0.0 }
 0x5e0   : > { %1748 = vadd.xlane.f32.xlu0 %v1747_v60 }
 0x5ed   : > { %1509 = vrot.lane.b32.xlu1 %v3768_v63, %s3311_s22  ;;  %s4039_s22 = scalar_lea.vmem %s3974_s10, %s3496_s0 }
 0x5f6   : > { %1506 = vrot.lane.b32.xlu0 %v3768_v63, %s3313_s27  ;;  %s4041_s27 = smov (!%p2800_p1), %s4040_s23 }
 0x600   : > { %v1740_v61 = vpop.xlane.xlu1 %1739 }
 0x601   : > { %3192 = vrcp.f32 %v1740_v61 }
 0x60b   : > { %v3193_v62 = vpop.eup %3192 }
 0x60c   : > { %v1754_v0 = vmul.f32 %v3193_v62, %v3185_v37 }
 0x60e   : > { %v1758_v1 = vpack.c.bf16 %v1754_v0, %v1754_v0  ;;  %v3156_v0 = vld [vmem:[%s3544_s2 + $0x4] ss:$8 sps:$4 sm:$0xff]  }
 0x610   : > { %2954 = vmatmul.mubr.msk.bf16.vlgmr.msra.gmra.mrb[4].mxu0 %vm1713_vm6, %v1758_v1  ;;  %v3159_v1 = vld [vmem:[%s3544_s2 + $0x14] ss:$8 sps:$4 sm:$0xff]  }
 0x611   : > { %2965 = vmatprep.mubr.msk.bf16.mxu0 %vm3310_vm2, %v3309_v43 }
 0x665   : > { %v1743_v2 = vpop.xlane.xlu0 %1742 }
 0x666   : > { %3194 = vrcp.f32 %v1743_v2  ;;  %v3157_v2 = vld [vmem:[%s3544_s2 + $0x10] ss:$8 sps:$4 sm:$0xff]  }
 0x669   : > { %v1746_v3 = vpop.xlane.xlu1 %1745 }
 0x66a   : > { %3196 = vrcp.f32 %v1746_v3  ;;  %v3162_v3 = vld [vmem:[%s3544_s2 + $0x24] ss:$8 sps:$4 sm:$0xff]  }
 0x66d   : > { %v1749_v4 = vpop.xlane.xlu0 %1748  ;;  %v1510_v5 = vpop.permute.xlu1 %1509 }
 0x66e   : > { %3198 = vrcp.f32 %v1749_v4  ;;  %v1515_v63 = vpack.c.bf16 %v1510_v5, %v1510_v5  ;;  %v3160_v4 = vld [vmem:[%s3544_s2 + $0x20] ss:$8 sps:$4 sm:$0xff]   ;;  %v3163_v5 = vld [vmem:[%s3544_s2 + $0x30] ss:$8 sps:$4 sm:$0xff]  }
 0x670   : > { %v3195_v6 = vpop.eup %3194  ;;  %v1905_v15 = vsel %vm1765_vm4, %v1515_v63, 0  ;;  %v3167_v63 = vld [vmem:[%s3559_s4] sm:$0xff]  }
 0x671   : > { %v1755_v7 = vmul.f32 %v3195_v6, %v3187_v54  ;;  %v1507_v8 = vpop.permute.xlu0 %1506  ;;  %v3165_v6 = vld [vmem:[%s3544_s2 + $0x34] ss:$8 sps:$4 sm:$0xff]  }
 0x672   : > { %v1514_v9 = vpack.c.bf16 %v1507_v8, %v1507_v8  ;;  %v3168_v8 = vld [vmem:[%s3559_s4 + $0x48] sm:$0xff]  }
 0x673   : > { %v1759_v10 = vpack.c.bf16 %v1755_v7, %v1755_v7  ;;  %v3166_v7 = vld [vmem:[%s3559_s4 + $0x40] sm:$0xff]  }
 0x674   : > { %v3197_v11 = vpop.eup %3196  ;;  %v1859_v13 = vsel %vm1765_vm4, %v1514_v9, 0  ;;  %v3169_v9 = vld [vmem:[%s3559_s4 + $0x8] sm:$0xff]  }
 0x675   : > { %v1756_v14 = vmul.f32 %v3197_v11, %v3189_v56  ;;  %2960 = vmatmul.mubr.msk.bf16.vlgmr.msra.gmra.mrb[16].mxu1 %vm1713_vm6, %v1759_v10  ;;  %2964 = vmatpush3.bf16.msra.mxu0 %v1859_v13 }
 0x676   : > { %2970 = vmatpush3.bf16.msra.mxu1 %v1905_v15  ;;  %2971 = vmatprep.mubr.msk.bf16.mxu1 %vm3310_vm2, %v3309_v43  ;;  %v2772_v15 = vld [vmem:[%s4038_s29] ss:$0 sm:$0xff] }
 0x677   : > { %v1760_v16 = vpack.c.bf16 %v1756_v14, %v1756_v14  ;;  %2975 = vmatprep.subr.bf16.mxu0 %v3309_v43  ;;  %2141 = vmatprep.subr.bf16.mxu1 %v3156_v0 }
 0x678   : > { %v3199_v17 = vpop.eup %3198 }
 0x679   : > { %v1757_v18 = vmul.f32 %v3199_v17, %v3191_v59  ;;  %2966 = vmatmul.mubr.msk.bf16.vlgmr.msra.gmra.mrb[8].mxu0 %vm1713_vm6, %v1760_v16  ;;  %v2773_v17 = vld [vmem:[%s4039_s22] ss:$0 sm:$0xff] }
 0x67a   : > { %2983 = vmatprep.mubr.msk.bf16.mxu0 %vm3310_vm2, %v3309_v43  ;;  %2976 = vmatpush3.bf16.msra.mxu0 %v3150_v20 }
 0x67b   : > { %v1761_v19 = vpack.c.bf16 %v1757_v18, %v1757_v18  ;;  %2977 = vmatprep.subr.bf16.mxu0 %v3309_v43 }
 0x67d   : > { %2972 = vmatmul.mubr.msk.bf16.vlgmr.msra.gmra.mrb[20].mxu1 %vm1713_vm6, %v1761_v19 }
 0x67e   : > { %2173 = vmatprep.mubr.bf16.mxu1 %v3308_v23  ;;  %2978 = vmatpush3.bf16.msra.mxu0 %v3151_v26  ;;  %v3174_v26 = vld [vmem:[%s3559_s4 + $0x60] sm:$0xff]  }
 0x67f   : > { %2979 = vmatprep.subr.bf16.mxu0 %v3309_v43 }
 0x682   : > { %2980 = vmatpush3.bf16.msra.mxu0 %v3152_v27  ;;  %v3175_v27 = vld [vmem:[%s3559_s4 + $0x20] sm:$0xff]  }
 0x683   : > { %2981 = vmatprep.subr.bf16.mxu0 %v3309_v43 }
 0x686   : > { %2982 = vmatpush3.bf16.msra.mxu0 %v3153_v28  ;;  %v3176_v28 = vld [vmem:[%s3559_s4 + $0x68] sm:$0xff]  }
 0x687   : > { %2900 = vmatprep.subr.bf16.mxu0 %v3166_v7  ;;  %v3208_v7 = vld [vmem:[%s4041_s27 + $0x10] sm:$0xff] (!%p2800_p1)  }
 0x6e3   : > { %v1803_v21 = vpop.f32.mrb[4].mxu0 }
 0x6e4   : > { %v2955_v22 = vpop.f32.mrb[5].mxu0 }
 0x6e5   : > { %v1806_v24 = vpop.f32.mrb[6].mxu0  ;;  %v3171_v22 = vld [vmem:[%s3559_s4 + $0x10] sm:$0xff]  }
 0x6e6   : > { %v2956_v25 = vpop.f32.mrb[7].mxu0  ;;  %v3172_v24 = vld [vmem:[%s3559_s4 + $0x58] sm:$0xff]  }
 0x6e7   : > { %v3173_v25 = vld [vmem:[%s3559_s4 + $0x18] sm:$0xff]  }
 0x748   : > { %v1849_v29 = vpop.f32.mrb[16].mxu1 }
 0x749   : > { %1948 = vrot.lane.b32.xlu1 %v1849_v29, %s3316_s5  ;;  %v2961_v23 = vpop.f32.mrb[17].mxu1  ;;  %v3177_v29 = vld [vmem:[%s3559_s4 + $0x28] sm:$0xff]  }
 0x74a   : > { %v1852_v30 = vpop.f32.mrb[18].mxu1  ;;  %v3178_v23 = vld [vmem:[%s3559_s4 + $0x70] sm:$0xff]  }
 0x74b   : > { %v2962_v31 = vpop.f32.mrb[19].mxu1  ;;  %v3179_v30 = vld [vmem:[%s3559_s4 + $0x30] sm:$0xff]  }
 0x74c   : > { %v1895_v32 = vpop.f32.mrb[8].mxu0  ;;  %v3180_v31 = vld [vmem:[%s3559_s4 + $0x78] sm:$0xff]  }
 0x74d   : > { %1952 = vrot.lane.b32.xlu0 %v1895_v32, %s3317_s6  ;;  %v2967_v33 = vpop.f32.mrb[9].mxu0  ;;  %v3181_v32 = vld [vmem:[%s3559_s4 + $0x38] sm:$0xff]  }
 0x74e   : > { %v1898_v34 = vpop.f32.mrb[10].mxu0  ;;  %v2086_v33 = vld [vmem:[%s3549_s3] sm:$0x3]  ;;  %s4044_s3 = sld [smem:[#allocation28_spill]] (!%p2800_p1) }
 0x74f   : > { %v2968_v35 = vpop.f32.mrb[11].mxu0  ;;  %v2091_v34 = vrot.slane %v2086_v33, %v1396_v40 }
 0x750   : > { %v1941_v36 = vpop.f32.mrb[20].mxu1  ;;  %v2095_v35 = vrot.slane %v2086_v33, %v1400_v58 }
 0x751   : > { %1956 = vrot.lane.b32.xlu1 %v1941_v36, %s3318_s1  ;;  %v2973_v37 = vpop.f32.mrb[21].mxu1 }
 0x752   : > { %v1944_v43 = vpop.f32.mrb[22].mxu1 }
 0x753   : > { %v2974_v38 = vpop.f32.mrb[23].mxu1 }
 0x7bb   : > { %v1949_v41 = vpop.permute.xlu1 %1948 }
 0x7bc   : > { %v1959_v44 = vsel %vm1519_vm3, %v1803_v21, %v1949_v41  ;;  %v3170_v21 = vld [vmem:[%s3559_s4 + $0x50] sm:$0xff]  }
 0x7bf   : > { %v1953_v42 = vpop.permute.xlu0 %1952 }
 0x7c0   : > { %v1961_v45 = vsel %vm1960_vm7, %v1959_v44, %v1953_v42 }
 0x7c3   : > { %v1957_v46 = vpop.permute.xlu1 %1956 }
 0x7c4   : > { %v1963_v47 = vsel %vm1962_vm8, %v1961_v45, %v1957_v46 }
 0x7c5   : > { %v1964_v48 = vpack.c.bf16 %v1963_v47, %v1963_v47 }
 0x7c7   : > { %2984 = vmatmul.mubr.msk.bf16.vlgmr.msra.gmra.mrb[12].mxu0 %vm1354_vm1, %v1964_v48 }
 0x7c8   : > { %2901 = vmatpush3.bf16.msra.mxu0 %v3167_v63  ;;  %v3209_v63 = vld [vmem:[%s4041_s27 + $0x18] sm:$0xff] (!%p2800_p1)  }
 0x7c9   : > { %2902 = vmatprep.subr.bf16.mxu0 %v3168_v8 }
 0x7cc   : > { %2903 = vmatpush3.bf16.msra.mxu0 %v3169_v9 }
 0x7cd   : > { %2904 = vmatprep.subr.bf16.mxu0 %v3170_v21 }
 0x7d0   : > { %2905 = vmatpush3.bf16.msra.mxu0 %v3171_v22 }
 0x7d1   : > { %2906 = vmatprep.subr.bf16.mxu0 %v3172_v24 }
 0x7d4   : > { %2907 = vmatpush3.bf16.msra.mxu0 %v3173_v25 }
 0x7d5   : > { %2908 = vmatprep.subr.bf16.mxu0 %v3174_v26 }
 0x7d8   : > { %2909 = vmatpush3.bf16.msra.mxu0 %v3175_v27 }
 0x7d9   : > { %2910 = vmatprep.subr.bf16.mxu0 %v3176_v28 }
 0x7dc   : > { %2911 = vmatpush3.bf16.msra.mxu0 %v3177_v29 }
 0x7dd   : > { %2912 = vmatprep.subr.bf16.mxu0 %v3178_v23 }
 0x7e0   : > { %2913 = vmatpush3.bf16.msra.mxu0 %v3179_v30 }
 0x7e1   : > { %2914 = vmatprep.subr.bf16.mxu0 %v3180_v31 }
 0x7e4   : > { %2915 = vmatpush3.bf16.msra.mxu0 %v3181_v32 }
 0x89a   : > { %v2041_v50 = vpop.f32.mrb[12].mxu0 }
 0x89b   : > { %v2042_v51 = vadd.f32 %v2766_v49, %v2041_v50  ;;  %v2985_v52 = vpop.f32.mrb[13].mxu0 }
 0x89c   : > { %v2044_v53 = vpop.f32.mrb[14].mxu0 }
 0x89d   : > { %v3833_v54 = vadd.f32 %v2042_v51, %v3716_v12  ;;  %v2986_v55 = vpop.f32.mrb[15].mxu0  ;;  %v3154_v12 = vld [vmem:[%s3544_s2] ss:$8 sps:$4 sm:$0xff]   ;;  %s4042_s2 = sld [smem:[#allocation25_spill]] (!%p2800_p1) }
 0x89e   : > { %2142 = vmatpush1.bf16.msra.mxu1 %v3154_v12  ;;  %v2783_v55 = vld [vmem:[%s809_s25] ss:$0 sm:$0xff] }
 0x89f   : > { %v2050_v56 = vsel %vm1354_vm1, %v3833_v54, 0.0  ;;  %2143 = vmatprep.subr.bf16.mxu1 %v3159_v1 }
 0x8a0   : > { %2051 = vadd.xlane.f32.xlu0 %v2050_v56 }
 0x8a2   : > { %2144 = vmatpush1.bf16.msra.mxu1 %v3157_v2 }
 0x8a3   : > { %2145 = vmatprep.subr.bf16.mxu1 %v3162_v3 }
 0x8a6   : > { %2146 = vmatpush1.bf16.msra.mxu1 %v3160_v4 }
 0x8a7   : > { %2147 = vmatprep.subr.bf16.mxu1 %v3165_v6  ;;  %v3319_v6 = vmov (!%p2800_p1), 0.0  }
 0x8a8   : > { %2987 = vmatprep.subr.bf16.mxu0 (!%p2800_p1), %v3319_v6 }
 0x8aa   : > { %2148 = vmatpush1.bf16.msra.mxu1 %v3163_v5  ;;  %v3206_v5 = vld [vmem:[%s4040_s23] sm:$0xff] (!%p2800_p1)  }
 0x92d   : > { %v2052_v57 = vpop.xlane.xlu0 %2051 }
 0x92e   : > { %v2053_v59 = vmul.f32 0.015625, %v2052_v57 }
 0x930   : > { %v2054_v60 = vsub.f32 %v3833_v54, %v2053_v59 }
 0x932   : > { %v2055_v61 = vmul.f32 %v2054_v60, %v2054_v60 }
 0x934   : > { %v2056_v62 = vsel %vm1354_vm1, %v2055_v61, 0.0 }
 0x935   : > { %2057 = vadd.xlane.f32.xlu1 %v2056_v62 }
 0x9c2   : > { %v2058_v10 = vpop.xlane.xlu1 %2057 }
 0x9c3   : > { %v2059_v11 = vmul.f32 0.015625, %v2058_v10 }
 0x9c5   : > { %v2060_v13 = vadd.f32 1e-06, %v2059_v11 }
 0x9c7   : > { %3200 = vrsqrt.f32 %v2060_v13  ;;  %v2375_v13 = vld [vmem:[%s4042_s2] sm:$0x1] (!%p2800_p1) }
 0x9d1   : > { %v3201_v14 = vpop.eup %3200 }
 0x9d2   : > { %v2062_v16 = vmul.f32 %v3201_v14, %v2054_v60 }
 0x9d4   : > { %v2069_v18 = vmul.f32 %v2772_v15, %v2062_v16  ;;  %v2376_v15 = vld [vmem:[%s4043_s20] sm:$0x1] (!%p2800_p1) }
 0x9d6   : > { %v2076_v19 = vadd.f32 %v2773_v17, %v2069_v18 }
 0x9d8   : > { %v2077_v20 = vpack.c.bf16 %v2076_v19, %v2076_v19  ;;  %v2402_v19 = vld [vmem:[%s4044_s3] sm:$0x1] (!%p2800_p1) }
 0x9da   : > { %2782 = vmatmul.mubr.msk.bf16.vlgmr.msra.gmra.mrb[24].mxu1 %vm1354_vm1, %v2077_v20 }
 0xaad   : > { %v2175_v36 = vpop.f32.mrb[24].mxu1 }
 0xaae   : > { %v2176_v37 = vadd.f32 %v2175_v36, %v2091_v34  ;;  %v2177_v43 = vpop.f32.mrb[25].mxu1 }
 0xaaf   : > { %v2178_v38 = vadd.f32 %v2177_v43, %v2095_v35  ;;  %v2179_v41 = vpop.f32.mrb[26].mxu1 }
 0xab0   : > { %v2184_v42 = vmul.f32 0.70710677, %v2176_v37  ;;  %v2180_v44 = vpop.f32.mrb[27].mxu1  ;;  %v2182_v48 = vmul.f32 0.5, %v2176_v37 }
 0xab1   : > { %v2185_v45 = vmul.f32 0.70710677, %v2178_v38  ;;  %v2183_v50 = vmul.f32 0.5, %v2178_v38 }
 0xab2   : > { %3202 = verf.f32 %v2184_v42 }
 0xab3   : > { %3204 = verf.f32 %v2185_v45 }
 0xabc   : > { %v3203_v46 = vpop.eup %3202 }
 0xabd   : > { %v3205_v47 = vpop.eup %3204  ;;  %v2188_v49 = vadd.f32 1.0, %v3203_v46 }
 0xabe   : > { %v2189_v40 = vadd.f32 1.0, %v3205_v47 }
 0xabf   : > { %v2190_v51 = vmul.f32 %v2188_v49, %v2182_v48 }
 0xac0   : > { %v2191_v39 = vmul.f32 %v2189_v40, %v2183_v50 }
 0xac1   : > { %v2192_v52 = vpack.c.bf16 %v2190_v51, %v2190_v51 }
 0xac2   : > { %v2193_v58 = vpack.c.bf16 %v2191_v39, %v2191_v39 }
 0xac4   : > { %2361 = vmatprep.mubr.bf16.mxu0 %v2193_v58 }
 0xac5   : > { %2362 = vmatmul.mubr.bf16.vlgmr.msra.gmra.mrb[16].mxu0 %v2192_v52 }
 0xac6   : > { %2995 = vmatprep.mubr.msk.bf16.mxu0 (!%p2800_p1), %vm3320_vm10, %v3319_v6  ;;  %2988 = vmatpush3.bf16.msra.mxu0 (!%p2800_p1), %v3206_v5 }
 0xac7   : > { %2989 = vmatprep.subr.bf16.mxu0 (!%p2800_p1), %v3319_v6 }
 0xb98   : > { %v2916_v53 = vpop.f32.mrb[16].mxu0 }
 0xb99   : > { %v2917_v56 = vpop.f32.mrb[17].mxu0 }
 0xb9a   : > { %v2918_v57 = vadd.f32 %v2917_v56, %v2916_v53  ;;  %v2919_v59 = vpop.f32.mrb[18].mxu0  ;;  %2374 = sbr.rel (%p2800_p1) target bundleno = 3506 (0xdb2), region = 104 }
 0xb9b   : > { %v2920_v60 = vpop.f32.mrb[19].mxu0 }
 0xb9c   : > { %v2364_v61 = vadd.f32 %v2918_v57, %v2783_v55 }
 0xb9e   : > { %v2369_v62 = vadd.f32 %v2364_v61, %v3833_v54  ;;  %v3207_v54 = vld [vmem:[%s4041_s27 + $0x8] sm:$0xff] (!%p2800_p1)  }
 0xb9f   : > { %2990 = vmatpush3.bf16.msra.mxu0 (!%p2800_p1), %v3207_v54 }
 0xba0   : > { %2370 = vst.msk [vmem:[#allocation2] sm:$0xff] %vm1354_vm1, %v2369_v62  ;;  %v2378_v0 = vsel (!%p2800_p1), %vm2377_vm9, %v2369_v62, 0.0  ;;  %2991 = vmatprep.subr.bf16.mxu0 (!%p2800_p1), %v3319_v6 }
 0xba1   : > { %2379 = vadd.xlane.f32.xlu0 %v2378_v0 }
 0xba3   : > { %2992 = vmatpush3.bf16.msra.mxu0 %v3208_v7 }
 0xba4   : > { %2993 = vmatprep.subr.bf16.mxu0 %v3319_v6 }
 0xba7   : > { %2994 = vmatpush3.bf16.msra.mxu0 %v3209_v63 }
 0xc2e   : > { %v2380_v12 = vpop.xlane.xlu0 %2379 }
 0xc2f   : > { %v2381_v1 = vmul.f32 0.015625, %v2380_v12 }
 0xc31   : > { %v2382_v2 = vsub.f32 %v2369_v62, %v2381_v1 }
 0xc33   : > { %v2383_v3 = vmul.f32 %v2382_v2, %v2382_v2 }
 0xc35   : > { %v2384_v4 = vsel %vm2377_vm9, %v2383_v3, 0.0 }
 0xc36   : > { %2385 = vadd.xlane.f32.xlu0 %v2384_v4 }
 0xcc3   : > { %v2386_v8 = vpop.xlane.xlu0 %2385 }
 0xcc4   : > { %v2387_v9 = vmul.f32 0.015625, %v2386_v8 }
 0xcc6   : > { %v2388_v10 = vadd.f32 1e-06, %v2387_v9 }
 0xcc8   : > { %3210 = vrsqrt.f32 %v2388_v10 }
 0xcd2   : > { %v3211_v11 = vpop.eup %3210 }
 0xcd3   : > { %v2390_v14 = vmul.f32 %v3211_v11, %v2382_v2 }
 0xcd5   : > { %v2391_v16 = vmul.f32 %v2390_v14, %v2375_v13 }
 0xcd7   : > { %v2392_v17 = vadd.f32 %v2391_v16, %v2376_v15 }
 0xcd9   : > { %v2393_v18 = vpack.c.bf16 %v2392_v17, %v2392_v17 }
 0xcdb   : > { %2996 = vmatmul.mubr.msk.bf16.vlgmr.msra.gmra.mrb[0].mxu0 %vm1354_vm1, %v2393_v18 }
 0xdae   : > { %v2464_v20 = vpop.f32.mrb[0].mxu0 }
 0xdaf   : > { %v2465_v21 = vadd.f32 %v2464_v20, %v2402_v19  ;;  %v2997_v22 = vpop.f32.mrb[1].mxu0 }
 0xdb0   : > { %v2467_v24 = vpop.f32.mrb[2].mxu0 }
 0xdb1   : > { %2470 = vst [vmem:[%s3563_s26] sm:$0x1] %v2465_v21  ;;  %v2998_v25 = vpop.f32.mrb[3].mxu0 }
 0xdb2 PF: > { %s4045_s4 = sld [smem:[#allocation8_spill]]  ;;  %s2484_s6 = sshll.u32 %s3563_s26, 4  ;;  %s2485_s6 = int_to_ptr.vmem [resolvable:$true] %s2484_s6 }
 0xdb3   : > { %s4047_s15 = sld [smem:[#allocation29_spill]]  ;;  %s4048_s1 = sand.u32 1, %s3282_s30  }
 0xdb4   : > { %s2472_s19 = scalar_lea.sflag [#allocation4], %s4048_s1  ;;  %s3212_s18 = scalar_lea.vmem %s2485_s6, 16 }
 0xdb5   : > { %p3213_p2 = scmp.ne.s32.totalorder %s2485_s6, %s3212_s18  ;;  %s3321_s24 = smov [#allocation3]  }
 0xdb6   : > { %s3216_s2 = sshll.u32 %s3321_s24, 4  ;;  %s3217_s2 = int_to_ptr.vmem [resolvable:$false] %s3216_s2 }
 0xdb7   : > { %p3214_p4 = pnand %p3213_p2, %p3471_p3  ;;  %s3218_s28 = scalar_lea.vmem %s3217_s2, 32 }
 0xdb8   : > { %s2806_s25 = sshll.u32 %s4045_s4, 4  ;;  %p3219_p6 = scmp.lt.s32.totalorder %s2485_s6, %s3217_s2 }
 0xdb9   : > { %s3914_s5 = scalar_lea.hbm %s4047_s15, %s2806_s25  ;;  %p3215_p5 = pneg %p3214_p4 }
 0xdba   : > { %p3220_p7 = scmp.lt.s32.totalorder %s3218_s28, %s3212_s18 }
 0xdbc   : > { %p3221_p8 = por %p3220_p7, %p3219_p6 }
 0xdbe   : > { %p3222_p10 = pnand %p3221_p8, %p3215_p5 }
 0xdc0   : > { %3225 = shalt.err (!%p3222_p10)
}
 0xdc1   : > { %s3226_s26 = scalar_lea.hbm %s3914_s5, 16  ;;  %s3230_s16 = scalar_lea.hbm %s4047_s15, 32 }
 0xdc2   : > { %p3227_p11 = scmp.ne.s32.totalorder %s3914_s5, %s3226_s26  ;;  %p3231_p0 = scmp.lt.u32.totalorder %s3914_s5, %s4047_s15 }
 0xdc3   : > { %p3232_p1 = scmp.lt.u32.totalorder %s3230_s16, %s3226_s26  ;;  %p3234_p4 = scmp.lt.u32.totalorder %s3226_s26, %s3914_s5 }
 0xdc4   : > { %p3228_p12 = pnand %p3227_p11, %p3471_p3 }
 0xdc5   : > { %p3233_p2 = por %p3232_p1, %p3231_p0 }
 0xdc6   : > { %p3229_p13 = pneg %p3228_p12 }
 0xdc7   : > { %p3235_p5 = por %p3234_p4, %p3233_p2 }
 0xdc9   : > { %p3236_p6 = pnand %p3235_p5, %p3229_p13 }
 0xdcb   : > { %3239 = shalt.err (!%p3236_p6)
}
 0xdcc   : > { %3000 = dma.vmem_to_hbm [thread:$0]  (%p3471_p3), %s2485_s6, 16, %s3914_s5, %s2472_s19  }
 0xdcd PF: > { %s4049_s4 = sld [smem:[#allocation11_spill]]  ;;  %s4050_s25 = sld [smem:[#allocation6_spill]] }
 0xdd3   : > { %p3006_p7 = scmp.ge.s32.totalorder %s4049_s4, 2  ;;  %s2496_s21 = sand.u32 1, %s4050_s25  }
 0xdd4   : > { %s2497_s1 = scalar_lea.sflag [#allocation4], %s2496_s21 }
 0xdd5   : > { %p3003_p8 = pnand %p3006_p7, %p3481_p9 }
 0xdd7   : > { %3273 = dma.done.wait (!%p3003_p8), %s2497_s1, 16  }
 0xdd8   : > { %3275 = vsyncadd (!%p3003_p8), %s2497_s1, 4294967280  ;;  %s32_s23 = sadd.s32 1, %s4049_s4   ;;  %s4052_s18 = sld [smem:[#allocation7_spill]] }
 0xdd9   : > { %p29_p10 = scmp.ge.s32.totalorder %s32_s23, 6   ;;  %s4053_s20 = sld [smem:[#allocation16_spill]] }
 0xdda   : > { %s4054_s21 = sld [smem:[#allocation9_spill]]  ;;  %s4055_s1 = sld [smem:[#allocation10_spill]] }
 0xddb   : > { %s4056_s22 = sld [smem:[#allocation12_spill]]  ;;  %s4057_s2 = sld [smem:[#allocation14_spill]] }
 0xddc   : > { %s4058_s0 = smov %s3282_s30  ;;  %31 = sbr.rel (!%p29_p10) target bundleno = 18 (0x12), region = 175 }
 0xdde   : > { %s4059_s30 = smov %s4052_s18 }
 0xde3   :  { %2501 = vsyncpa [#allocation4], 1 }
 0xde4   :  { %2503 = vsyncpa [#allocation4 + $0x1], 1 }

</bundles_post_ra>
